<compile_context>
chip_gen: v7x
topology: tpu7x:2x2x1
jax: 0.10.0
libtpu: 0.0.40
codegen_flags: <defaults>
</compile_context>

<pallas_src>
import jax
import jax.numpy as jnp
from jax import lax
from jax.experimental import pallas as pl
from jax.experimental.pallas import tpu as pltpu


def _attention_kernel(xq_ref, xkv_ref, wq_ref, wk_ref, wv_ref, wo_ref, bo_ref,
                      o_ref, acc_ref):
    """One grid step = (batch b, query-tile qi, head h).

    xq_ref : (1, TQ, D) bf16   query rows of this tile
    xkv_ref: (1, N,  D) bf16   full sequence rows (key/value source, unpadded)
    wq/wk/wv_ref: (H, D, dh) bf16   resident per-head projection weights
    wo_ref : (H, dh, D) bf16   resident per-head output-projection weights
    bo_ref : (1, D)     f32    output bias
    o_ref  : (1, TQ, D)        output tile (written once, at the last head)
    acc_ref: (TQ, D)    f32    output accumulator across heads for this (b, qi)
    """
    h = pl.program_id(2)

    @pl.when(h == 0)
    def _init():
        acc_ref[...] = jnp.zeros_like(acc_ref)

    xq = xq_ref[0]                                     # (TQ, D) bf16
    xkv = xkv_ref[0]                                   # (N, D)  bf16

    # Per-head projections on the MXU (softmax scale pre-folded into W_q).
    # Only this head's q/k/v are live -> no (N, 3*inner) intermediate.
    q = jnp.dot(xq, wq_ref[h], preferred_element_type=jnp.float32).astype(jnp.bfloat16)
    k = jnp.dot(xkv, wk_ref[h], preferred_element_type=jnp.float32).astype(jnp.bfloat16)
    v = jnp.dot(xkv, wv_ref[h], preferred_element_type=jnp.float32).astype(jnp.bfloat16)

    # scores = (q * scale) @ k^T
    s = lax.dot_general(q, k, (((1,), (1,)), ((), ())),
                        preferred_element_type=jnp.float32)         # (TQ, N) f32

    m = jnp.max(s, axis=-1, keepdims=True)
    # exp kept in f32: safe on v5e (no bf16 EUP); on v6e/v7x switching to
    # exp((s - m).astype(bf16)) would ~double EUP throughput for large N.
    e = jnp.exp(s - m)                                               # (TQ, N) f32
    l = jnp.sum(e, axis=-1, keepdims=True)                           # (TQ, 1)

    pv = jnp.dot(e.astype(jnp.bfloat16), v,
                 preferred_element_type=jnp.float32)                 # (TQ, dh) f32
    # Deferred normalization: scale (TQ, dh) instead of (TQ, N); EUP reciprocal.
    o_h = (pv * pl.reciprocal(l, approx=True)).astype(jnp.bfloat16)

    # Per-head output projection accumulated in f32 (no concatenate).
    acc_ref[...] += jnp.dot(o_h, wo_ref[h], preferred_element_type=jnp.float32)

    @pl.when(h == pl.num_programs(2) - 1)
    def _finalize():
        o_ref[0] = (acc_ref[...] + bo_ref[...]).astype(o_ref.dtype)


def attention_pallas(x, w_qkv, w_out, b_out, *, heads, dim_heads, q_tile=None):
    """x: (B, N, D). w_qkv: (D, 3*heads*dim_heads), no bias.
    w_out: (heads*dim_heads, D). b_out: (1, D)."""
    B, N, D = x.shape
    inner = heads * dim_heads
    scale = dim_heads ** (-0.5)
    out_dtype = x.dtype
    bf = jnp.bfloat16

    # ---- host-side parameter prep (cached per-model in real use) ----
    w32 = w_qkv.astype(jnp.float32)
    # Fold the softmax scale into W_q (removes an O(heads*N*N) VPU pass).
    w_q = (w32[:, :inner] * scale).reshape(D, heads, dim_heads).transpose(1, 0, 2).astype(bf)
    w_k = w32[:, inner:2 * inner].reshape(D, heads, dim_heads).transpose(1, 0, 2).astype(bf)
    w_v = w32[:, 2 * inner:].reshape(D, heads, dim_heads).transpose(1, 0, 2).astype(bf)
    w_o = w_out.astype(bf).reshape(heads, dim_heads, D)
    b_o = b_out.astype(jnp.float32).reshape(1, D)

    x_kv = x.astype(bf)                      # key/value source rows: never padded

    # Flash-style query tiling: full rows while the (TQ, N) score tile is small;
    # otherwise 512-row query tiles (bounds VMEM on v7x and adds a second
    # parallel grid axis so both v7x TensorCores get work).
    if q_tile is None:
        q_tile = N if N <= 1024 else 512
    tq = min(q_tile, N)
    n_qt = -(-N // tq)                       # cdiv
    n_pad = n_qt * tq
    if not (tq % 8 == 0 or tq == n_pad):
        raise ValueError("q_tile must be a multiple of 8 or cover the full sequence")
    x_q = x_kv if n_pad == N else jnp.pad(x_kv, ((0, 0), (0, n_pad - N), (0, 0)))
    # TODO(synk): for very long sequences also tile the KV axis (true flash inner
    # loop with K/V cached across query tiles) so the per-head K/V projection is
    # not recomputed per query tile.
    # TODO(synk): for tiny dim_heads (<64) pack several heads per 128-lane group
    # (batched dot_general) to improve MXU/lane utilization.

    # VMEM budget: ~3/4 of physical (~96 MiB on v5e/v6e, ~48 MiB on v7x).
    try:
        vmem_limit = int(pltpu.get_tpu_info().vmem_capacity_bytes) * 3 // 4
    except Exception:
        vmem_limit = 64 * 1024 * 1024

    def run(single_buffer_weights):
        def resident(shape):
            # Grid-invariant operand: constant index map (never re-fetched);
            # single-buffer it when supported to halve its VMEM footprint.
            nd = len(shape)
            if single_buffer_weights:
                return pl.BlockSpec(shape, lambda b, qi, h: (0,) * nd,
                                    pipeline_mode=pl.Buffered(1))
            return pl.BlockSpec(shape, lambda b, qi, h: (0,) * nd)

        return pl.pallas_call(
            _attention_kernel,
            out_shape=jax.ShapeDtypeStruct((B, n_pad, D), out_dtype),
            grid=(B, n_qt, heads),
            in_specs=[
                pl.BlockSpec((1, tq, D), lambda b, qi, h: (b, qi, 0)),   # query tile
                pl.BlockSpec((1, N, D), lambda b, qi, h: (b, 0, 0)),     # full KV rows
                resident((heads, D, dim_heads)),                          # W_q (scaled)
                resident((heads, D, dim_heads)),                          # W_k
                resident((heads, D, dim_heads)),                          # W_v
                resident((heads, dim_heads, D)),                          # W_out
                resident((1, D)),                                         # b_out
            ],
            out_specs=pl.BlockSpec((1, tq, D), lambda b, qi, h: (b, qi, 0)),
            scratch_shapes=[pltpu.VMEM((tq, D), jnp.float32)],
            compiler_params=pltpu.CompilerParams(
                dimension_semantics=("parallel", "parallel", "arbitrary"),
                vmem_limit_bytes=vmem_limit,
            ),
        )(x_q, x_kv, w_q, w_k, w_v, w_o, b_o)

    try:
        y_p = run(single_buffer_weights=True)
    except Exception:
        # jax build without BlockSpec(pipeline_mode=pl.Buffered(1)):
        # fall back to default double-buffering (identical results).
        y_p = run(single_buffer_weights=False)

    return y_p[:, :N, :]


def attention_reference(x, w_qkv, w_out, b_out, *, heads, dim_heads):
    """Pure-JAX f32 reference mirroring the PyTorch forward exactly."""
    B, N, D = x.shape
    inner = heads * dim_heads
    scale = dim_heads ** (-0.5)
    qkv = x @ w_qkv
    q, k, v = jnp.split(qkv, 3, axis=-1)

    def split_heads(t):
        return t.reshape(B, N, heads, dim_heads).transpose(0, 2, 1, 3)

    q, k, v = map(split_heads, (q, k, v))
    dots = jnp.einsum('bhnd,bhmd->bhnm', q, k) * scale
    attn = jax.nn.softmax(dots, axis=-1)
    out = jnp.einsum('bhnm,bhmd->bhnd', attn, v)
    out = out.transpose(0, 2, 1, 3).reshape(B, N, inner)
    return out @ w_out + b_out


def attention_reference_bf16(x, w_qkv, w_out, b_out, *, heads, dim_heads):
    """Pure-JAX reference matching the kernel's bf16-MXU / f32-accumulate path."""
    bf = jnp.bfloat16
    B, N, D = x.shape
    inner = heads * dim_heads
    scale = dim_heads ** (-0.5)
    w32 = w_qkv.astype(jnp.float32)
    wq = (w32[:, :inner] * scale).reshape(D, heads, dim_heads).transpose(1, 0, 2).astype(bf)
    wk = w32[:, inner:2 * inner].reshape(D, heads, dim_heads).transpose(1, 0, 2).astype(bf)
    wv = w32[:, 2 * inner:].reshape(D, heads, dim_heads).transpose(1, 0, 2).astype(bf)
    wo = w_out.astype(bf).reshape(heads, dim_heads, D)
    xb = x.astype(bf)
    q = jnp.einsum('bnd,hde->bhne', xb, wq, preferred_element_type=jnp.float32).astype(bf)
    k = jnp.einsum('bnd,hde->bhne', xb, wk, preferred_element_type=jnp.float32).astype(bf)
    v = jnp.einsum('bnd,hde->bhne', xb, wv, preferred_element_type=jnp.float32).astype(bf)
    s = jnp.einsum('bhne,bhme->bhnm', q, k, preferred_element_type=jnp.float32)
    m = jnp.max(s, axis=-1, keepdims=True)
    e = jnp.exp(s - m)
    l = jnp.sum(e, axis=-1, keepdims=True)
    pv = jnp.einsum('bhnm,bhme->bhne', e.astype(bf), v, preferred_element_type=jnp.float32)
    oh = (pv / l).astype(bf)
    y = jnp.einsum('bhne,hed->bnd', oh, wo, preferred_element_type=jnp.float32)
    return y + b_out.astype(jnp.float32)


if __name__ == "__main__":
    key = jax.random.PRNGKey(0)

    def make_params(k, dim, heads, dim_heads):
        inner = heads * dim_heads
        kq, kw, kb = jax.random.split(k, 3)
        w_qkv = jax.random.normal(kq, (dim, 3 * inner), dtype=jnp.float32) * (dim ** -0.5)
        w_out = jax.random.normal(kw, (inner, dim), dtype=jnp.float32) * (inner ** -0.5)
        b_out = jax.random.normal(kb, (1, dim), dtype=jnp.float32) * 0.01
        return w_qkv, w_out, b_out

    def check(x, w_qkv, w_out, b_out, *, heads, dim_heads, q_tile=None):
        y = attention_pallas(x, w_qkv, w_out, b_out, heads=heads,
                             dim_heads=dim_heads, q_tile=q_tile)
        y = jax.block_until_ready(y)
        assert y.shape == x.shape
        # Tight check vs the precision-matched (bf16-MXU / f32-accumulate) reference.
        y_bf = attention_reference_bf16(x, w_qkv, w_out, b_out,
                                        heads=heads, dim_heads=dim_heads)
        assert jnp.allclose(y, y_bf, atol=2e-2, rtol=2e-2), "mismatch vs bf16-matched reference"
        # Loose check vs the exact f32 PyTorch-semantics reference (bf16 MXU tolerance).
        y_f32 = attention_reference(x, w_qkv, w_out, b_out,
                                    heads=heads, dim_heads=dim_heads)
        assert jnp.allclose(y, y_f32, atol=1e-1, rtol=1e-1), "mismatch vs f32 reference"

    k1, k2, kp1, kp2 = jax.random.split(key, 4)

    # 1) Small shapes consistent with the module's forward (batch=2, seq=8, dim=32).
    B, N, dim, heads, dim_heads = 2, 8, 32, 4, 16
    x = jax.random.normal(k1, (B, N, dim), dtype=jnp.float32)
    w_qkv, w_out, b_out = make_params(kp1, dim, heads, dim_heads)
    check(x, w_qkv, w_out, b_out, heads=heads, dim_heads=dim_heads)

    # 2) ViT-ish shape exercising the query-tile grid axis and padded query rows.
    B, N, dim, heads, dim_heads = 1, 200, 128, 8, 64
    x = jax.random.normal(k2, (B, N, dim), dtype=jnp.float32)
    w_qkv, w_out, b_out = make_params(kp2, dim, heads, dim_heads)
    check(x, w_qkv, w_out, b_out, heads=heads, dim_heads=dim_heads, q_tile=64)

    print("KERNEL_OK")
</pallas_src>

<mosaic_0001>
module attributes {stable_mosaic.version = 11 : i64} {
  func.func @_attention_kernel(%arg0: i32, %arg1: i32, %arg2: i32, %arg3: memref<1x8x32xbf16, #tpu.memory_space<vmem>>, %arg4: memref<1x8x32xbf16, #tpu.memory_space<vmem>>, %arg5: memref<4x32x16xbf16, #tpu.memory_space<vmem>>, %arg6: memref<4x32x16xbf16, #tpu.memory_space<vmem>>, %arg7: memref<4x32x16xbf16, #tpu.memory_space<vmem>>, %arg8: memref<4x16x32xbf16, #tpu.memory_space<vmem>>, %arg9: memref<1x32xf32, #tpu.memory_space<vmem>>, %arg10: memref<1x8x32xf32, #tpu.memory_space<vmem>>, %arg11: memref<8x32xf32, #tpu.memory_space<vmem>>) attributes {dimension_semantics = [#tpu.dimension_semantics<parallel>, #tpu.dimension_semantics<parallel>, #tpu.dimension_semantics<arbitrary>], iteration_bounds = array<i64: 2, 1, 4>, scalar_prefetch = 0 : i64, scratch_operands = 1 : i64, tpu.core_type = #tpu.core_type<tc>, window_params = [{transform_indices = @transform_0, window_bounds = array<i64: 1, 8, 32>}, {transform_indices = @transform_1, window_bounds = array<i64: 1, 8, 32>}, {pipeline_mode = #tpu.pipeline_mode<synchronous>, transform_indices = @transform_2, window_bounds = array<i64: 4, 32, 16>}, {pipeline_mode = #tpu.pipeline_mode<synchronous>, transform_indices = @transform_3, window_bounds = array<i64: 4, 32, 16>}, {pipeline_mode = #tpu.pipeline_mode<synchronous>, transform_indices = @transform_4, window_bounds = array<i64: 4, 32, 16>}, {pipeline_mode = #tpu.pipeline_mode<synchronous>, transform_indices = @transform_5, window_bounds = array<i64: 4, 16, 32>}, {pipeline_mode = #tpu.pipeline_mode<synchronous>, transform_indices = @transform_6, window_bounds = array<i64: 1, 32>}, {transform_indices = @transform_7, window_bounds = array<i64: 1, 8, 32>}]} {
    %c0_i32 = arith.constant 0 : i32
    %0 = arith.cmpi eq, %arg2, %c0_i32 : i32
    %1 = arith.extui %0 : i1 to i32
    %c0_i32_0 = arith.constant 0 : i32
    %2 = arith.cmpi ne, %1, %c0_i32_0 : i32
    scf.if %2 {
      %cst_26 = arith.constant 0.000000e+00 : f32
      %46 = vector.broadcast %cst_26 : f32 to vector<8x32xf32>
      %c0_27 = arith.constant 0 : index
      %c0_28 = arith.constant 0 : index
      %47 = vector.load %arg11[%c0_27, %c0_28] : memref<8x32xf32, #tpu.memory_space<vmem>>, vector<8x32xf32>
      tpu.vector_store %arg11[%c0_27, %c0_28], %46 {strides = array<i32>} : memref<8x32xf32, #tpu.memory_space<vmem>>, vector<8x32xf32>,
    } else {
    }
    %c0 = arith.constant 0 : index
    %c0_1 = arith.constant 0 : index
    %c0_2 = arith.constant 0 : index
    %3 = vector.load %arg3[%c0, %c0_1, %c0_2] : memref<1x8x32xbf16, #tpu.memory_space<vmem>>, vector<1x8x32xbf16>
    %4 = vector.shape_cast %3 : vector<1x8x32xbf16> to vector<8x32xbf16>
    %c0_3 = arith.constant 0 : index
    %c0_4 = arith.constant 0 : index
    %c0_5 = arith.constant 0 : index
    %5 = vector.load %arg4[%c0_3, %c0_4, %c0_5] : memref<1x8x32xbf16, #tpu.memory_space<vmem>>, vector<1x8x32xbf16>
    %6 = vector.shape_cast %5 : vector<1x8x32xbf16> to vector<8x32xbf16>
    %7 = arith.index_cast %arg2 : i32 to index
    %c0_6 = arith.constant 0 : index
    %c0_7 = arith.constant 0 : index
    %8 = vector.load %arg5[%7, %c0_6, %c0_7] : memref<4x32x16xbf16, #tpu.memory_space<vmem>>, vector<1x32x16xbf16>
    %9 = vector.shape_cast %8 : vector<1x32x16xbf16> to vector<32x16xbf16>
    %cst = arith.constant dense<0.000000e+00> : vector<8x16xf32>
    %10 = tpu.matmul %4, %9, %cst {dimension_numbers = #tpu.dot_dimension_numbers<[1], [0], [0], [1], [0, 0, 1, 1], [], []>} : vector<8x32xbf16>, vector<32x16xbf16>, vector<8x16xf32> -> vector<8x16xf32>
    %11 = arith.truncf %10 : vector<8x16xf32> to vector<8x16xbf16>
    %12 = arith.index_cast %arg2 : i32 to index
    %c0_8 = arith.constant 0 : index
    %c0_9 = arith.constant 0 : index
    %13 = vector.load %arg6[%12, %c0_8, %c0_9] : memref<4x32x16xbf16, #tpu.memory_space<vmem>>, vector<1x32x16xbf16>
    %14 = vector.shape_cast %13 : vector<1x32x16xbf16> to vector<32x16xbf16>
    %cst_10 = arith.constant dense<0.000000e+00> : vector<8x16xf32>
    %15 = tpu.matmul %6, %14, %cst_10 {dimension_numbers = #tpu.dot_dimension_numbers<[1], [0], [0], [1], [0, 0, 1, 1], [], []>} : vector<8x32xbf16>, vector<32x16xbf16>, vector<8x16xf32> -> vector<8x16xf32>
    %16 = arith.truncf %15 : vector<8x16xf32> to vector<8x16xbf16>
    %17 = arith.index_cast %arg2 : i32 to index
    %c0_11 = arith.constant 0 : index
    %c0_12 = arith.constant 0 : index
    %18 = vector.load %arg7[%17, %c0_11, %c0_12] : memref<4x32x16xbf16, #tpu.memory_space<vmem>>, vector<1x32x16xbf16>
    %19 = vector.shape_cast %18 : vector<1x32x16xbf16> to vector<32x16xbf16>
    %cst_13 = arith.constant dense<0.000000e+00> : vector<8x16xf32>
    %20 = tpu.matmul %6, %19, %cst_13 {dimension_numbers = #tpu.dot_dimension_numbers<[1], [0], [0], [1], [0, 0, 1, 1], [], []>} : vector<8x32xbf16>, vector<32x16xbf16>, vector<8x16xf32> -> vector<8x16xf32>
    %21 = arith.truncf %20 : vector<8x16xf32> to vector<8x16xbf16>
    %cst_14 = arith.constant dense<0.000000e+00> : vector<8x8xf32>
    %22 = tpu.matmul %11, %16, %cst_14 {dimension_numbers = #tpu.dot_dimension_numbers<[1], [1], [0], [0], [0, 0, 1, 0], [], []>} : vector<8x16xbf16>, vector<8x16xbf16>, vector<8x8xf32> -> vector<8x8xf32>
    %cst_15 = arith.constant dense<0xFF800000> : vector<8xf32>
    %23 = vector.multi_reduction <maximumf>, %22, %cst_15 [1] : vector<8x8xf32> to vector<8xf32>
    %24 = vector.shape_cast %23 : vector<8xf32> to vector<8x1xf32>
    %25 = vector.broadcast %24 : vector<8x1xf32> to vector<8x8xf32>
    %26 = arith.subf %22, %25 : vector<8x8xf32>
    %27 = math.exp %26 : vector<8x8xf32>
    %cst_16 = arith.constant dense<0.000000e+00> : vector<8xf32>
    %28 = vector.multi_reduction <add>, %27, %cst_16 [1] : vector<8x8xf32> to vector<8xf32>
    %29 = vector.shape_cast %28 : vector<8xf32> to vector<8x1xf32>
    %30 = arith.truncf %27 : vector<8x8xf32> to vector<8x8xbf16>
    %cst_17 = arith.constant dense<0.000000e+00> : vector<8x16xf32>
    %31 = tpu.matmul %30, %21, %cst_17 {dimension_numbers = #tpu.dot_dimension_numbers<[1], [0], [0], [1], [0, 0, 1, 1], [], []>} : vector<8x8xbf16>, vector<8x16xbf16>, vector<8x16xf32> -> vector<8x16xf32>
    %32 = tpu.reciprocal %29 {approx = true} : vector<8x1xf32> -> vector<8x1xf32>
    %33 = vector.broadcast %32 : vector<8x1xf32> to vector<8x16xf32>
    %34 = arith.mulf %31, %33 : vector<8x16xf32>
    %35 = arith.truncf %34 : vector<8x16xf32> to vector<8x16xbf16>
    %c0_18 = arith.constant 0 : index
    %c0_19 = arith.constant 0 : index
    %36 = vector.load %arg11[%c0_18, %c0_19] : memref<8x32xf32, #tpu.memory_space<vmem>>, vector<8x32xf32>
    %37 = arith.index_cast %arg2 : i32 to index
    %c0_20 = arith.constant 0 : index
    %c0_21 = arith.constant 0 : index
    %38 = vector.load %arg8[%37, %c0_20, %c0_21] : memref<4x16x32xbf16, #tpu.memory_space<vmem>>, vector<1x16x32xbf16>
    %39 = vector.shape_cast %38 : vector<1x16x32xbf16> to vector<16x32xbf16>
    %cst_22 = arith.constant dense<0.000000e+00> : vector<8x32xf32>
    %40 = tpu.matmul %35, %39, %cst_22 {dimension_numbers = #tpu.dot_dimension_numbers<[1], [0], [0], [1], [0, 0, 1, 1], [], []>} : vector<8x16xbf16>, vector<16x32xbf16>, vector<8x32xf32> -> vector<8x32xf32>
    %41 = arith.addf %36, %40 : vector<8x32xf32>
    %c0_23 = arith.constant 0 : index
    %c0_24 = arith.constant 0 : index
    %42 = vector.load %arg11[%c0_23, %c0_24] : memref<8x32xf32, #tpu.memory_space<vmem>>, vector<8x32xf32>
    tpu.vector_store %arg11[%c0_23, %c0_24], %41 {strides = array<i32>} : memref<8x32xf32, #tpu.memory_space<vmem>>, vector<8x32xf32>,
    %c3_i32 = arith.constant 3 : i32
    %43 = arith.cmpi eq, %arg2, %c3_i32 : i32
    %44 = arith.extui %43 : i1 to i32
    %c0_i32_25 = arith.constant 0 : i32
    %45 = arith.cmpi ne, %44, %c0_i32_25 : i32
    scf.if %45 {
      %c0_26 = arith.constant 0 : index
      %c0_27 = arith.constant 0 : index
      %46 = vector.load %arg11[%c0_26, %c0_27] : memref<8x32xf32, #tpu.memory_space<vmem>>, vector<8x32xf32>
      %c0_28 = arith.constant 0 : index
      %c0_29 = arith.constant 0 : index
      %47 = vector.load %arg9[%c0_28, %c0_29] : memref<1x32xf32, #tpu.memory_space<vmem>>, vector<1x32xf32>
      %48 = vector.broadcast %47 : vector<1x32xf32> to vector<8x32xf32>
      %49 = arith.addf %46, %48 : vector<8x32xf32>
      %c0_30 = arith.constant 0 : index
      %c0_31 = arith.constant 0 : index
      %c0_32 = arith.constant 0 : index
      %50 = vector.load %arg10[%c0_30, %c0_31, %c0_32] : memref<1x8x32xf32, #tpu.memory_space<vmem>>, vector<1x8x32xf32>
      %51 = vector.shape_cast %50 : vector<1x8x32xf32> to vector<8x32xf32>
      %52 = vector.shape_cast %49 : vector<8x32xf32> to vector<1x8x32xf32>
      tpu.vector_store %arg10[%c0_30, %c0_31, %c0_32], %52 {strides = array<i32>} : memref<1x8x32xf32, #tpu.memory_space<vmem>>, vector<1x8x32xf32>,
    } else {
    }
    return
  }
  func.func @transform_0(%arg0: i32, %arg1: i32, %arg2: i32) -> (i32, i32, i32) {
    %c0_i32 = arith.constant 0 : i32
    %c0_i32_0 = arith.constant 0 : i32
    return %arg0, %arg1, %c0_i32 : i32, i32, i32
  }
  func.func @transform_1(%arg0: i32, %arg1: i32, %arg2: i32) -> (i32, i32, i32) {
    %c0_i32 = arith.constant 0 : i32
    %c0_i32_0 = arith.constant 0 : i32
    %c0_i32_1 = arith.constant 0 : i32
    return %arg0, %c0_i32, %c0_i32_0 : i32, i32, i32
  }
  func.func @transform_2(%arg0: i32, %arg1: i32, %arg2: i32) -> (i32, i32, i32) {
    %c0_i32 = arith.constant 0 : i32
    %c0_i32_0 = arith.constant 0 : i32
    %c0_i32_1 = arith.constant 0 : i32
    %c0_i32_2 = arith.constant 0 : i32
    return %c0_i32, %c0_i32_0, %c0_i32_1 : i32, i32, i32
  }
  func.func @transform_3(%arg0: i32, %arg1: i32, %arg2: i32) -> (i32, i32, i32) {
    %c0_i32 = arith.constant 0 : i32
    %c0_i32_0 = arith.constant 0 : i32
    %c0_i32_1 = arith.constant 0 : i32
    %c0_i32_2 = arith.constant 0 : i32
    return %c0_i32, %c0_i32_0, %c0_i32_1 : i32, i32, i32
  }
  func.func @transform_4(%arg0: i32, %arg1: i32, %arg2: i32) -> (i32, i32, i32) {
    %c0_i32 = arith.constant 0 : i32
    %c0_i32_0 = arith.constant 0 : i32
    %c0_i32_1 = arith.constant 0 : i32
    %c0_i32_2 = arith.constant 0 : i32
    return %c0_i32, %c0_i32_0, %c0_i32_1 : i32, i32, i32
  }
  func.func @transform_5(%arg0: i32, %arg1: i32, %arg2: i32) -> (i32, i32, i32) {
    %c0_i32 = arith.constant 0 : i32
    %c0_i32_0 = arith.constant 0 : i32
    %c0_i32_1 = arith.constant 0 : i32
    %c0_i32_2 = arith.constant 0 : i32
    return %c0_i32, %c0_i32_0, %c0_i32_1 : i32, i32, i32
  }
  func.func @transform_6(%arg0: i32, %arg1: i32, %arg2: i32) -> (i32, i32) {
    %c0_i32 = arith.constant 0 : i32
    %c0_i32_0 = arith.constant 0 : i32
    %c0_i32_1 = arith.constant 0 : i32
    return %c0_i32, %c0_i32_0 : i32, i32
  }
  func.func @transform_7(%arg0: i32, %arg1: i32, %arg2: i32) -> (i32, i32, i32) {
    %c0_i32 = arith.constant 0 : i32
    %c0_i32_0 = arith.constant 0 : i32
    return %arg0, %arg1, %c0_i32 : i32, i32, i32
  }
}

module attributes {stable_mosaic.version = 11 : i64} {
  func.func @_attention_kernel(%arg0: i32, %arg1: i32, %arg2: i32, %arg3: memref<1x8x32xbf16, #tpu.memory_space<vmem>>, %arg4: memref<1x8x32xbf16, #tpu.memory_space<vmem>>, %arg5: memref<4x32x16xbf16, #tpu.memory_space<vmem>>, %arg6: memref<4x32x16xbf16, #tpu.memory_space<vmem>>, %arg7: memref<4x32x16xbf16, #tpu.memory_space<vmem>>, %arg8: memref<4x16x32xbf16, #tpu.memory_space<vmem>>, %arg9: memref<1x32xf32, #tpu.memory_space<vmem>>, %arg10: memref<1x8x32xf32, #tpu.memory_space<vmem>>, %arg11: memref<8x32xf32, #tpu.memory_space<vmem>>) attributes {dimension_semantics = [#tpu.dimension_semantics<parallel>, #tpu.dimension_semantics<parallel>, #tpu.dimension_semantics<arbitrary>], iteration_bounds = array<i64: 2, 1, 4>, scalar_prefetch = 0 : i64, scratch_operands = 1 : i64, tpu.core_type = #tpu.core_type<tc>, window_params = [{transform_indices = @transform_0, window_bounds = array<i64: 1, 8, 32>}, {transform_indices = @transform_1, window_bounds = array<i64: 1, 8, 32>}, {pipeline_mode = #tpu.pipeline_mode<synchronous>, transform_indices = @transform_2, window_bounds = array<i64: 4, 32, 16>}, {pipeline_mode = #tpu.pipeline_mode<synchronous>, transform_indices = @transform_3, window_bounds = array<i64: 4, 32, 16>}, {pipeline_mode = #tpu.pipeline_mode<synchronous>, transform_indices = @transform_4, window_bounds = array<i64: 4, 32, 16>}, {pipeline_mode = #tpu.pipeline_mode<synchronous>, transform_indices = @transform_5, window_bounds = array<i64: 4, 16, 32>}, {pipeline_mode = #tpu.pipeline_mode<synchronous>, transform_indices = @transform_6, window_bounds = array<i64: 1, 32>}, {transform_indices = @transform_7, window_bounds = array<i64: 1, 8, 32>}]} {
    %c0_i32 = arith.constant 0 : i32
    %0 = arith.cmpi eq, %arg2, %c0_i32 : i32
    %1 = arith.extui %0 : i1 to i32
    %c0_i32_0 = arith.constant 0 : i32
    %2 = arith.cmpi ne, %1, %c0_i32_0 : i32
    scf.if %2 {
      %cst_26 = arith.constant 0.000000e+00 : f32
      %46 = vector.broadcast %cst_26 : f32 to vector<8x32xf32>
      %c0_27 = arith.constant 0 : index
      %c0_28 = arith.constant 0 : index
      %47 = vector.load %arg11[%c0_27, %c0_28] : memref<8x32xf32, #tpu.memory_space<vmem>>, vector<8x32xf32>
      tpu.vector_store %arg11[%c0_27, %c0_28], %46 {strides = array<i32>} : memref<8x32xf32, #tpu.memory_space<vmem>>, vector<8x32xf32>,
    } else {
    }
    %c0 = arith.constant 0 : index
    %c0_1 = arith.constant 0 : index
    %c0_2 = arith.constant 0 : index
    %3 = vector.load %arg3[%c0, %c0_1, %c0_2] : memref<1x8x32xbf16, #tpu.memory_space<vmem>>, vector<1x8x32xbf16>
    %4 = vector.shape_cast %3 : vector<1x8x32xbf16> to vector<8x32xbf16>
    %c0_3 = arith.constant 0 : index
    %c0_4 = arith.constant 0 : index
    %c0_5 = arith.constant 0 : index
    %5 = vector.load %arg4[%c0_3, %c0_4, %c0_5] : memref<1x8x32xbf16, #tpu.memory_space<vmem>>, vector<1x8x32xbf16>
    %6 = vector.shape_cast %5 : vector<1x8x32xbf16> to vector<8x32xbf16>
    %7 = arith.index_cast %arg2 : i32 to index
    %c0_6 = arith.constant 0 : index
    %c0_7 = arith.constant 0 : index
    %8 = vector.load %arg5[%7, %c0_6, %c0_7] : memref<4x32x16xbf16, #tpu.memory_space<vmem>>, vector<1x32x16xbf16>
    %9 = vector.shape_cast %8 : vector<1x32x16xbf16> to vector<32x16xbf16>
    %cst = arith.constant dense<0.000000e+00> : vector<8x16xf32>
    %10 = tpu.matmul %4, %9, %cst {dimension_numbers = #tpu.dot_dimension_numbers<[1], [0], [0], [1], [0, 0, 1, 1], [], []>} : vector<8x32xbf16>, vector<32x16xbf16>, vector<8x16xf32> -> vector<8x16xf32>
    %11 = arith.truncf %10 : vector<8x16xf32> to vector<8x16xbf16>
    %12 = arith.index_cast %arg2 : i32 to index
    %c0_8 = arith.constant 0 : index
    %c0_9 = arith.constant 0 : index
    %13 = vector.load %arg6[%12, %c0_8, %c0_9] : memref<4x32x16xbf16, #tpu.memory_space<vmem>>, vector<1x32x16xbf16>
    %14 = vector.shape_cast %13 : vector<1x32x16xbf16> to vector<32x16xbf16>
    %cst_10 = arith.constant dense<0.000000e+00> : vector<8x16xf32>
    %15 = tpu.matmul %6, %14, %cst_10 {dimension_numbers = #tpu.dot_dimension_numbers<[1], [0], [0], [1], [0, 0, 1, 1], [], []>} : vector<8x32xbf16>, vector<32x16xbf16>, vector<8x16xf32> -> vector<8x16xf32>
    %16 = arith.truncf %15 : vector<8x16xf32> to vector<8x16xbf16>
    %17 = arith.index_cast %arg2 : i32 to index
    %c0_11 = arith.constant 0 : index
    %c0_12 = arith.constant 0 : index
    %18 = vector.load %arg7[%17, %c0_11, %c0_12] : memref<4x32x16xbf16, #tpu.memory_space<vmem>>, vector<1x32x16xbf16>
    %19 = vector.shape_cast %18 : vector<1x32x16xbf16> to vector<32x16xbf16>
    %cst_13 = arith.constant dense<0.000000e+00> : vector<8x16xf32>
    %20 = tpu.matmul %6, %19, %cst_13 {dimension_numbers = #tpu.dot_dimension_numbers<[1], [0], [0], [1], [0, 0, 1, 1], [], []>} : vector<8x32xbf16>, vector<32x16xbf16>, vector<8x16xf32> -> vector<8x16xf32>
    %21 = arith.truncf %20 : vector<8x16xf32> to vector<8x16xbf16>
    %cst_14 = arith.constant dense<0.000000e+00> : vector<8x8xf32>
    %22 = tpu.matmul %11, %16, %cst_14 {dimension_numbers = #tpu.dot_dimension_numbers<[1], [1], [0], [0], [0, 0, 1, 0], [], []>} : vector<8x16xbf16>, vector<8x16xbf16>, vector<8x8xf32> -> vector<8x8xf32>
    %cst_15 = arith.constant dense<0xFF800000> : vector<8xf32>
    %23 = vector.multi_reduction <maximumf>, %22, %cst_15 [1] : vector<8x8xf32> to vector<8xf32>
    %24 = vector.shape_cast %23 : vector<8xf32> to vector<8x1xf32>
    %25 = vector.broadcast %24 : vector<8x1xf32> to vector<8x8xf32>
    %26 = arith.subf %22, %25 : vector<8x8xf32>
    %27 = math.exp %26 : vector<8x8xf32>
    %cst_16 = arith.constant dense<0.000000e+00> : vector<8xf32>
    %28 = vector.multi_reduction <add>, %27, %cst_16 [1] : vector<8x8xf32> to vector<8xf32>
    %29 = vector.shape_cast %28 : vector<8xf32> to vector<8x1xf32>
    %30 = arith.truncf %27 : vector<8x8xf32> to vector<8x8xbf16>
    %cst_17 = arith.constant dense<0.000000e+00> : vector<8x16xf32>
    %31 = tpu.matmul %30, %21, %cst_17 {dimension_numbers = #tpu.dot_dimension_numbers<[1], [0], [0], [1], [0, 0, 1, 1], [], []>} : vector<8x8xbf16>, vector<8x16xbf16>, vector<8x16xf32> -> vector<8x16xf32>
    %32 = tpu.reciprocal %29 {approx = true} : vector<8x1xf32> -> vector<8x1xf32>
    %33 = vector.broadcast %32 : vector<8x1xf32> to vector<8x16xf32>
    %34 = arith.mulf %31, %33 : vector<8x16xf32>
    %35 = arith.truncf %34 : vector<8x16xf32> to vector<8x16xbf16>
    %c0_18 = arith.constant 0 : index
    %c0_19 = arith.constant 0 : index
    %36 = vector.load %arg11[%c0_18, %c0_19] : memref<8x32xf32, #tpu.memory_space<vmem>>, vector<8x32xf32>
    %37 = arith.index_cast %arg2 : i32 to index
    %c0_20 = arith.constant 0 : index
    %c0_21 = arith.constant 0 : index
    %38 = vector.load %arg8[%37, %c0_20, %c0_21] : memref<4x16x32xbf16, #tpu.memory_space<vmem>>, vector<1x16x32xbf16>
    %39 = vector.shape_cast %38 : vector<1x16x32xbf16> to vector<16x32xbf16>
    %cst_22 = arith.constant dense<0.000000e+00> : vector<8x32xf32>
    %40 = tpu.matmul %35, %39, %cst_22 {dimension_numbers = #tpu.dot_dimension_numbers<[1], [0], [0], [1], [0, 0, 1, 1], [], []>} : vector<8x16xbf16>, vector<16x32xbf16>, vector<8x32xf32> -> vector<8x32xf32>
    %41 = arith.addf %36, %40 : vector<8x32xf32>
    %c0_23 = arith.constant 0 : index
    %c0_24 = arith.constant 0 : index
    %42 = vector.load %arg11[%c0_23, %c0_24] : memref<8x32xf32, #tpu.memory_space<vmem>>, vector<8x32xf32>
    tpu.vector_store %arg11[%c0_23, %c0_24], %41 {strides = array<i32>} : memref<8x32xf32, #tpu.memory_space<vmem>>, vector<8x32xf32>,
    %c3_i32 = arith.constant 3 : i32
    %43 = arith.cmpi eq, %arg2, %c3_i32 : i32
    %44 = arith.extui %43 : i1 to i32
    %c0_i32_25 = arith.constant 0 : i32
    %45 = arith.cmpi ne, %44, %c0_i32_25 : i32
    scf.if %45 {
      %c0_26 = arith.constant 0 : index
      %c0_27 = arith.constant 0 : index
      %46 = vector.load %arg11[%c0_26, %c0_27] : memref<8x32xf32, #tpu.memory_space<vmem>>, vector<8x32xf32>
      %c0_28 = arith.constant 0 : index
      %c0_29 = arith.constant 0 : index
      %47 = vector.load %arg9[%c0_28, %c0_29] : memref<1x32xf32, #tpu.memory_space<vmem>>, vector<1x32xf32>
      %48 = vector.broadcast %47 : vector<1x32xf32> to vector<8x32xf32>
      %49 = arith.addf %46, %48 : vector<8x32xf32>
      %c0_30 = arith.constant 0 : index
      %c0_31 = arith.constant 0 : index
      %c0_32 = arith.constant 0 : index
      %50 = vector.load %arg10[%c0_30, %c0_31, %c0_32] : memref<1x8x32xf32, #tpu.memory_space<vmem>>, vector<1x8x32xf32>
      %51 = vector.shape_cast %50 : vector<1x8x32xf32> to vector<8x32xf32>
      %52 = vector.shape_cast %49 : vector<8x32xf32> to vector<1x8x32xf32>
      tpu.vector_store %arg10[%c0_30, %c0_31, %c0_32], %52 {strides = array<i32>} : memref<1x8x32xf32, #tpu.memory_space<vmem>>, vector<1x8x32xf32>,
    } else {
    }
    return
  }
  func.func @transform_0(%arg0: i32, %arg1: i32, %arg2: i32) -> (i32, i32, i32) {
    %c0_i32 = arith.constant 0 : i32
    %c0_i32_0 = arith.constant 0 : i32
    return %arg0, %arg1, %c0_i32 : i32, i32, i32
  }
  func.func @transform_1(%arg0: i32, %arg1: i32, %arg2: i32) -> (i32, i32, i32) {
    %c0_i32 = arith.constant 0 : i32
    %c0_i32_0 = arith.constant 0 : i32
    %c0_i32_1 = arith.constant 0 : i32
    return %arg0, %c0_i32, %c0_i32_0 : i32, i32, i32
  }
  func.func @transform_2(%arg0: i32, %arg1: i32, %arg2: i32) -> (i32, i32, i32) {
    %c0_i32 = arith.constant 0 : i32
    %c0_i32_0 = arith.constant 0 : i32
    %c0_i32_1 = arith.constant 0 : i32
    %c0_i32_2 = arith.constant 0 : i32
    return %c0_i32, %c0_i32_0, %c0_i32_1 : i32, i32, i32
  }
  func.func @transform_3(%arg0: i32, %arg1: i32, %arg2: i32) -> (i32, i32, i32) {
    %c0_i32 = arith.constant 0 : i32
    %c0_i32_0 = arith.constant 0 : i32
    %c0_i32_1 = arith.constant 0 : i32
    %c0_i32_2 = arith.constant 0 : i32
    return %c0_i32, %c0_i32_0, %c0_i32_1 : i32, i32, i32
  }
  func.func @transform_4(%arg0: i32, %arg1: i32, %arg2: i32) -> (i32, i32, i32) {
    %c0_i32 = arith.constant 0 : i32
    %c0_i32_0 = arith.constant 0 : i32
    %c0_i32_1 = arith.constant 0 : i32
    %c0_i32_2 = arith.constant 0 : i32
    return %c0_i32, %c0_i32_0, %c0_i32_1 : i32, i32, i32
  }
  func.func @transform_5(%arg0: i32, %arg1: i32, %arg2: i32) -> (i32, i32, i32) {
    %c0_i32 = arith.constant 0 : i32
    %c0_i32_0 = arith.constant 0 : i32
    %c0_i32_1 = arith.constant 0 : i32
    %c0_i32_2 = arith.constant 0 : i32
    return %c0_i32, %c0_i32_0, %c0_i32_1 : i32, i32, i32
  }
  func.func @transform_6(%arg0: i32, %arg1: i32, %arg2: i32) -> (i32, i32) {
    %c0_i32 = arith.constant 0 : i32
    %c0_i32_0 = arith.constant 0 : i32
    %c0_i32_1 = arith.constant 0 : i32
    return %c0_i32, %c0_i32_0 : i32, i32
  }
  func.func @transform_7(%arg0: i32, %arg1: i32, %arg2: i32) -> (i32, i32, i32) {
    %c0_i32 = arith.constant 0 : i32
    %c0_i32_0 = arith.constant 0 : i32
    return %arg0, %arg1, %c0_i32 : i32, i32, i32
  }
}

</mosaic_0001>

<bundles_post_ra>
// kernel: tpu_custom_call.1
= control target key start
LH: loop header
LB: loop body
LE: loop exit
PB: predicated region body
PF: predicated region fallthrough
CT: control target
= control target key end

     0   :  { %s2015_s0 = inlined_call_operand.hbm [shape: bf16[2,8,32], index: 0, kind: input, shape index: {}]   ;;  %s2016_s1 = inlined_call_operand.hbm [shape: bf16[2,8,32], index: 1, kind: input, shape index: {}]   ;;  %s2017_s2 = inlined_call_operand.hbm [shape: bf16[4,32,16], index: 2, kind: input, shape index: {}]   ;;  %s2018_s3 = inlined_call_operand.hbm [shape: bf16[4,32,16], index: 3, kind: input, shape index: {}]   ;;  %s2019_s4 = inlined_call_operand.hbm [shape: bf16[4,32,16], index: 4, kind: input, shape index: {}]   ;;  %s2020_s5 = inlined_call_operand.hbm [shape: bf16[4,16,32], index: 5, kind: input, shape index: {}]   ;;  %s2021_s6 = inlined_call_operand.hbm [shape: f32[1,32], index: 6, kind: input, shape index: {}]   ;;  %s2022_s7 = inlined_call_operand.hbm [shape: f32[2,8,32], index: 7, kind: output, shape index: {}]  }
   0x1   :  { %2030 = sst [smem:[#allocation25_spill]] %s2017_s2 }
   0x2   :  { %2031 = sst [smem:[#allocation26_spill]] %s2018_s3 }
   0x3   :  { %2032 = sst [smem:[#allocation27_spill]] %s2019_s4 }
   0x4   :  { %2033 = sst [smem:[#allocation28_spill]] %s2020_s5 }
   0x5   :  { %2034 = sst [smem:[#allocation29_spill]] %s2021_s6 }
   0x6   :  { %2035 = sst [smem:[#allocation30_spill]] %s2022_s7 }
   0x7   :  { %12 = vsyncpa [#allocation4], 0 }
   0x8   :  { %14 = vsyncpa [#allocation4 + $0x1], 0 }
   0x9   :  { %15 = vsyncpa [#allocation7], 0 }
   0xa   :  { %17 = vsyncpa [#allocation7 + $0x1], 0 }
   0xb   :  { %18 = vsyncpa [#allocation10], 0 }
   0xc   :  { %19 = vsyncpa [#allocation13], 0 }
   0xd   :  { %20 = vsyncpa [#allocation5], 0 }
   0xe   :  { %22 = vsyncpa [#allocation5 + $0x1], 0  ;;  %s1605_s24 = smov 0   ;;  %s1607_s25 = smov 0  }
   0xf   :  { %s1609_s26 = smov 0   ;;  %s1611_s27 = smov 0  }
  0x10   :  { %s1613_s28 = smov 0   ;;  %s1615_s29 = smov 0  }
  0x11   :  { %s1617_s30 = smov 0   ;;  %s1619_s8 = smov 0  }
  0x12 LB: > { %2036 = sst [smem:[#allocation22_spill]] %s1534_s27  ;;  %s1646_s9 = sadd.s32 4294967295, %s1550_s8   ;;  %s1550_s8 = sphi %s1619_s8, %s28_s8   ;;  %s1546_s30 = sphi %s1617_s30, %s2074_s30   ;;  %s1542_s29 = sphi %s1615_s29, %s2073_s29   ;;  %s1538_s28 = sphi %s1613_s28, %s2072_s28   ;;  %s1534_s27 = sphi %s1611_s27, %s2071_s27   ;;  %s1530_s26 = sphi %s1609_s26, %s2070_s26   ;;  %s1526_s25 = sphi %s1607_s25, %s2069_s25   ;;  %s1522_s24 = sphi %s1605_s24, %s2068_s24  }
  0x13   : > { %2037 = sst [smem:[#allocation23_spill]] %s1538_s28  ;;  %p979_p0 = scmp.ge.s32.totalorder %s1550_s8, 1 }
  0x14   : > { %p2025_p1 = scmp.eq.s32.totalorder %s1646_s9, 0  ;;  %p239_p2 = scmp.lt.s32.totalorder %s1550_s8, 9 }
  0x15   : > { %s1552_s11 = smov [#allocation8]   ;;  %s1553_s14 = smov [#allocation9]  }
  0x16   : > { %p1651_p3 = pnand %p979_p0, %p239_p2  ;;  %s251_s12 = sshll.u32 %s1552_s11, 4  ;;  %s1655_s12 = int_to_ptr.vmem [resolvable:$true] %s251_s12 }
  0x17   : > { %s264_s15 = sshll.u32 %s1553_s14, 4  ;;  %s1554_s16 = smov [#allocation12]   ;;  %s1665_s15 = int_to_ptr.vmem [resolvable:$true] %s264_s15 }
  0x18   : > { %s2038_s10 = scalar_select %p1651_p3, 1, 0 }
  0x19   : > { %p1112_p4 = pneg %p1651_p3  ;;  %s1667_s17 = sshll.u32 %s1554_s16, 4  ;;  %s291_s17 = int_to_ptr.vmem [resolvable:$true] %s1667_s17 }
  0x1a   : > { %s2040_s2 = sld [smem:[#allocation25_spill]] }
  0x1b   : > { %p1661_p5 = pnand %p1112_p4, %p2025_p1 }
  0x1d   : > { %p1677_p7 = pneg %p1661_p5 }
  0x20   : > { %s1236_s20 = scalar_lea.hbm %s2040_s2, 1024 }
  0x21   : > { %p1237_p6 = scmp.ne.s32.totalorder %s2040_s2, %s1236_s20  ;;  %p1243_p10 = scmp.lt.u32.totalorder %s1236_s20, %s2040_s2 }
  0x23   : > { %p1239_p8 = pnand %p1677_p7, %p1237_p6 }
  0x25   : > { %p1240_p9 = pneg %p1239_p8 }
  0x27   : > { %p1245_p11 = pnand %p1243_p10, %p1240_p9 }
  0x29   : > { %1248 = shalt.err (!%p1245_p11)
}
  0x2a   : > { %s1249_s16 = scalar_lea.vmem %s1655_s12, 1024  ;;  %p1257_p2 = scmp.lt.s32.totalorder %s1655_s12, %s1655_s12 }
  0x2b   : > { %p1250_p12 = scmp.ne.s32.totalorder %s1655_s12, %s1249_s16  ;;  %p1258_p4 = scmp.lt.s32.totalorder %s1249_s16, %s1249_s16 }
  0x2d   : > { %p1252_p13 = pnand %p1250_p12, %p1677_p7  ;;  %p1259_p6 = por %p1258_p4, %p1257_p2 }
  0x2f   : > { %p1253_p0 = pneg %p1252_p13 }
  0x31   : > { %p1260_p8 = pnand %p1259_p6, %p1253_p0 }
  0x33   : > { %1263 = shalt.err (!%p1260_p8)
}
  0x34   : > { %s1555_s18 = smov 64   ;;  %s1556_s19 = smov 4  }
  0x35   : > { %1115 = dma.hbm_to_vmem [thread:$0]  (!%p1661_p5), %s2040_s2, 1024, %s1655_s12, [#allocation7], %s1555_s18, %s1555_s18, %s1556_s19  }
  0x36   : > { %s2042_s3 = sld [smem:[#allocation26_spill]] }
  0x3c   : > { %s1264_s14 = scalar_lea.hbm %s2042_s3, 1024 }
  0x3d   : > { %p1265_p9 = scmp.ne.s32.totalorder %s2042_s3, %s1264_s14  ;;  %p1271_p12 = scmp.lt.u32.totalorder %s1264_s14, %s2042_s3 }
  0x3f   : > { %p1267_p10 = pnand %p1265_p9, %p1677_p7 }
  0x41   : > { %p1268_p11 = pneg %p1267_p10 }
  0x43   : > { %p1273_p13 = pnand %p1271_p12, %p1268_p11 }
  0x45   : > { %1276 = shalt.err (!%p1273_p13)
}
  0x46   : > { %s1277_s12 = scalar_lea.vmem %s1665_s15, 1024  ;;  %p1285_p6 = scmp.lt.s32.totalorder %s1665_s15, %s1665_s15 }
  0x47   : > { %p1278_p0 = scmp.ne.s32.totalorder %s1665_s15, %s1277_s12  ;;  %p1286_p8 = scmp.lt.s32.totalorder %s1277_s12, %s1277_s12 }
  0x49   : > { %p1280_p2 = pnand %p1278_p0, %p1677_p7  ;;  %p1287_p9 = por %p1286_p8, %p1285_p6 }
  0x4b   : > { %p1281_p4 = pneg %p1280_p2 }
  0x4d   : > { %p1288_p10 = pnand %p1287_p9, %p1281_p4 }
  0x4f   : > { %1291 = shalt.err (!%p1288_p10)
}
  0x50   : > { %1118 = dma.hbm_to_vmem [thread:$0]  (!%p1661_p5), %s2042_s3, 1024, %s1665_s15, [#allocation10], %s1555_s18, %s1555_s18, %s1556_s19  }
  0x51   : > { %s2043_s5 = sld [smem:[#allocation28_spill]] }
  0x57   : > { %s1292_s21 = scalar_lea.hbm %s2043_s5, 512 }
  0x58   : > { %p1293_p11 = scmp.ne.s32.totalorder %s2043_s5, %s1292_s21  ;;  %p1299_p0 = scmp.lt.u32.totalorder %s1292_s21, %s2043_s5 }
  0x5a   : > { %p1295_p12 = pnand %p1293_p11, %p1677_p7 }
  0x5c   : > { %p1296_p13 = pneg %p1295_p12 }
  0x5e   : > { %p1301_p2 = pnand %p1299_p0, %p1296_p13 }
  0x60   : > { %1304 = shalt.err (!%p1301_p2)
}
  0x61   : > { %s1305_s12 = scalar_lea.vmem %s291_s17, 512  ;;  %p1313_p9 = scmp.lt.s32.totalorder %s291_s17, %s291_s17 }
  0x62   : > { %p1306_p4 = scmp.ne.s32.totalorder %s291_s17, %s1305_s12  ;;  %p1314_p10 = scmp.lt.s32.totalorder %s1305_s12, %s1305_s12 }
  0x64   : > { %p1308_p6 = pnand %p1306_p4, %p1677_p7  ;;  %p1315_p1 = por %p1314_p10, %p1313_p9 }
  0x66   : > { %p1309_p8 = pneg %p1308_p6 }
  0x68   : > { %p1316_p3 = pnand %p1315_p1, %p1309_p8 }
  0x6a   : > { %1319 = shalt.err (!%p1316_p3)
}
  0x6b   : > { %1124 = dma.hbm_to_vmem [thread:$0]  (!%p1661_p5), %s2043_s5, 512, %s291_s17, [#allocation13], %s1555_s18, %s1555_s18, %s1556_s19  }
  0x6c   : > { %s1557_s27 = smov [#allocation11]   ;;  %s1558_s20 = smov [#allocation14]  }
  0x6d   : > { %s277_s28 = sshll.u32 %s1557_s27, 4  ;;  %s304_s21 = sshll.u32 %s1558_s20, 4  ;;  %s278_s28 = int_to_ptr.vmem [resolvable:$true] %s277_s28  ;;  %s305_s21 = int_to_ptr.vmem [resolvable:$true] %s304_s21 }
  0x6e   : > { %s2044_s4 = sld [smem:[#allocation27_spill]] }
  0x74   : > { %s1320_s14 = scalar_lea.hbm %s2044_s4, 1024 }
  0x75   : > { %p1321_p1 = scmp.ne.s32.totalorder %s2044_s4, %s1320_s14  ;;  %p1327_p12 = scmp.lt.u32.totalorder %s1320_s14, %s2044_s4 }
  0x77   : > { %p1323_p3 = pnand %p1321_p1, %p1677_p7 }
  0x79   : > { %p1324_p11 = pneg %p1323_p3 }
  0x7b   : > { %p1329_p13 = pnand %p1327_p12, %p1324_p11 }
  0x7d   : > { %1332 = shalt.err (!%p1329_p13)
}
  0x7e   : > { %s1333_s17 = scalar_lea.vmem %s278_s28, 1024  ;;  %p1341_p6 = scmp.lt.s32.totalorder %s278_s28, %s278_s28 }
  0x7f   : > { %p1334_p0 = scmp.ne.s32.totalorder %s278_s28, %s1333_s17  ;;  %p1342_p8 = scmp.lt.s32.totalorder %s1333_s17, %s1333_s17 }
  0x81   : > { %p1336_p2 = pnand %p1334_p0, %p1677_p7  ;;  %p1343_p9 = por %p1342_p8, %p1341_p6 }
  0x83   : > { %p1337_p4 = pneg %p1336_p2 }
  0x85   : > { %p1344_p10 = pnand %p1343_p9, %p1337_p4 }
  0x87   : > { %1347 = shalt.err (!%p1344_p10)
}
  0x88   : > { %1121 = dma.hbm_to_vmem [thread:$0]  (!%p1661_p5), %s2044_s4, 1024, %s278_s28, [#allocation10], %s1555_s18, %s1555_s18, %s1556_s19  }
  0x89   : > { %s2045_s6 = sld [smem:[#allocation29_spill]] }
  0x8f   : > { %s1348_s22 = scalar_lea.hbm %s2045_s6, 16 }
  0x90   : > { %p1349_p1 = scmp.ne.s32.totalorder %s2045_s6, %s1348_s22  ;;  %p1355_p12 = scmp.lt.u32.totalorder %s1348_s22, %s2045_s6 }
  0x92   : > { %p1351_p3 = pnand %p1349_p1, %p1677_p7 }
  0x94   : > { %p1352_p11 = pneg %p1351_p3 }
  0x96   : > { %p1357_p13 = pnand %p1355_p12, %p1352_p11 }
  0x98   : > { %1360 = shalt.err (!%p1357_p13)
}
  0x99   : > { %s1361_s15 = scalar_lea.vmem %s305_s21, 16  ;;  %s1368_s18 = scalar_lea.vmem %s305_s21, 32 }
  0x9a   : > { %p1362_p0 = scmp.ne.s32.totalorder %s305_s21, %s1361_s15  ;;  %p1369_p6 = scmp.lt.s32.totalorder %s305_s21, %s305_s21 }
  0x9b   : > { %p1370_p8 = scmp.lt.s32.totalorder %s1368_s18, %s1361_s15 }
  0x9c   : > { %p1364_p2 = pnand %p1362_p0, %p1677_p7 }
  0x9d   : > { %p1371_p9 = por %p1370_p8, %p1369_p6 }
  0x9e   : > { %p1365_p4 = pneg %p1364_p2 }
  0xa0   : > { %p1372_p10 = pnand %p1371_p9, %p1365_p4 }
  0xa2   : > { %1375 = shalt.err (!%p1372_p10)
}
  0xa3   : > { %1127 = dma.hbm_to_vmem [thread:$0]  (!%p1661_p5), %s2045_s6, 16, %s305_s21, [#allocation13]  }
  0xa4   : > { %s978_s23 = sadd.s32 4294967294, %s1550_s8   ;;  %s40_s17 = sadd.s32 1, %s1542_s29 }
  0xa5   : > { %s47_s2 = sadd.s32 1, %s1546_s30  ;;  %p41_p7 = scmp.ge.s32.totalorder %s40_s17, 4 }
  0xa6   : > { %s56_s13 = sadd.s32 1, %s1530_s26  ;;  %p63_p1 = scmp.ne.s32.totalorder %s1530_s26, %s1526_s25 }
  0xa7   : > { %p64_p3 = scmp.eq.s32.totalorder %s1550_s8, 0  ;;  %s2076_s17 = smov (%p41_p7, %s40_s17), 0 }
  0xa8   : > { %s2078_s2 = smov (!%p41_p7, %s47_s2), %s1546_s30  ;;  %p69_p5 = scmp.ne.s32.totalorder %s1526_s25, %s1522_s24 }
  0xa9   : > { %p1798_p11 = por %p64_p3, %p63_p1  ;;  %p49_p12 = scmp.ge.s32.totalorder %s2078_s2, 2 }
  0xaa   : > { %p226_p13 = scmp.eq.s32.totalorder %s1646_s9, 7  ;;  %p2047_p0 = scmp.eq.s32.totalorder %s1646_s9, 0 }
  0xab   : > { %p232_p4 = scmp.eq.s32.totalorder %s978_s23, 7  ;;  %s2080_s2 = smov (%p49_p12, %s2078_s2), 0 }
  0xac   : > { %p1807_p2 = por %p2047_p0, %p69_p5  ;;  %2049 = sst [smem:[#allocation24_spill]] %s2080_s2 }
  0xad   : > { %p1813_p6 = por %p226_p13, %p63_p1  ;;  %p1817_p8 = por %p232_p4, %p69_p5 }
  0xae   : > { %s2048_s21 = scalar_select %p1807_p2, 1, 0 }
  0xaf   : > { %s2050_s27 = scalar_select %p1813_p6, 1, 0 }
  0xb0   : > { %s2051_s20 = scalar_select %p1817_p8, 1, 0 }
  0xb1   : > { %s51_s22 = ssub.s32 %s1546_s30, %s2080_s2  ;;  %p1144_p9 = scmp.lt.s32.totalorder %s1550_s8, 8 }
  0xb2   : > { %p54_p10 = scmp.eq.s32.totalorder %s51_s22, 0  ;;  %s315_s11 = sand.u32 1, %s1530_s26  }
  0xb3   : > { %s1825_s14 = sshll.u32 %s315_s11, 2  ;;  %s987_s12 = sshll.u32 %s1546_s30, 6 }
  0xb4   : > { %s1828_s16 = scalar_select %p54_p10, %s1530_s26, %s56_s13  }
  0xb5   : > { %s1834_s19 = scalar_lea.hbm %s2015_s0, %s987_s12  ;;  %s319_s28 = scalar_lea.vmem [#allocation3], %s1825_s14 }
  0xb6   : > { %s327_s23 = sshll.u32 %s319_s28, 4  ;;  %p1841_p7 = pnand %p1144_p9, %p1798_p11  ;;  %s1837_s23 = int_to_ptr.vmem [resolvable:$true] %s327_s23 }
  0xb7   : > { %s1848_s15 = scalar_lea.hbm %s2016_s1, %s987_s12  ;;  %s334_s18 = sand.u32 1, %s1550_s8  }
  0xb8   : > { %s316_s4 = scalar_lea.sflag [#allocation4], %s315_s11  ;;  %s1376_s5 = scalar_lea.hbm %s1834_s19, 64 }
  0xb9   : > { %p1377_p1 = scmp.ne.s32.totalorder %s1834_s19, %s1376_s5  ;;  %p1378_p3 = pneg %p1841_p7 }
  0xba   : > { %s1381_s6 = scalar_lea.hbm %s2015_s0, 128  ;;  %p1382_p12 = scmp.lt.u32.totalorder %s1834_s19, %s2015_s0 }
  0xbb   : > { %p1379_p5 = pnand %p1378_p3, %p1377_p1  ;;  %p1383_p13 = scmp.lt.u32.totalorder %s1381_s6, %s1376_s5 }
  0xbc   : > { %p1385_p4 = scmp.lt.u32.totalorder %s1376_s5, %s1834_s19 }
  0xbd   : > { %p1380_p11 = pneg %p1379_p5  ;;  %p1384_p0 = por %p1383_p13, %p1382_p12 }
  0xbf   : > { %p1386_p9 = por %p1385_p4, %p1384_p0 }
  0xc1   : > { %p1387_p10 = pnand %p1386_p9, %p1380_p11 }
  0xc3   : > { %1390 = shalt.err (!%p1387_p10)
}
  0xc4   : > { %s1391_s11 = scalar_lea.vmem %s1837_s23, 64  ;;  %s1559_s12 = smov [#allocation3]  }
  0xc5   : > { %p1392_p1 = scmp.ne.s32.totalorder %s1837_s23, %s1391_s11  ;;  %s1396_s13 = sshll.u32 %s1559_s12, 4  ;;  %s1397_s13 = int_to_ptr.vmem [resolvable:$false] %s1396_s13 }
  0xc6   : > { %s1398_s2 = scalar_lea.vmem %s1397_s13, 128  ;;  %p1399_p6 = scmp.lt.s32.totalorder %s1837_s23, %s1397_s13 }
  0xc7   : > { %p1394_p5 = pnand %p1392_p1, %p1378_p3  ;;  %p1400_p12 = scmp.lt.s32.totalorder %s1398_s2, %s1391_s11 }
  0xc9   : > { %p1395_p8 = pneg %p1394_p5  ;;  %p1401_p13 = por %p1400_p12, %p1399_p6 }
  0xcb   : > { %p1402_p0 = pnand %p1401_p13, %p1395_p8 }
  0xcd   : > { %1405 = shalt.err (!%p1402_p0)
}
  0xce   : > { %1131 = dma.hbm_to_vmem [thread:$0]  (!%p1841_p7), %s1834_s19, 64, %s1837_s23, %s316_s4  }
  0xcf   : > { %s338_s5 = scalar_lea.vmem [#allocation6], %s1825_s14  ;;  %s335_s7 = scalar_lea.sflag [#allocation7], %s334_s18 }
  0xd0   : > { %s345_s6 = sshll.u32 %s338_s5, 4  ;;  %s1406_s28 = scalar_lea.hbm %s1848_s15, 64  ;;  %s346_s6 = int_to_ptr.vmem [resolvable:$true] %s345_s6 }
  0xd1   : > { %p1407_p6 = scmp.ne.s32.totalorder %s1848_s15, %s1406_s28  ;;  %s1411_s12 = scalar_lea.hbm %s2016_s1, 128 }
  0xd2   : > { %p1412_p4 = scmp.lt.u32.totalorder %s1848_s15, %s2016_s1  ;;  %p1413_p9 = scmp.lt.u32.totalorder %s1411_s12, %s1406_s28 }
  0xd3   : > { %p1409_p8 = pnand %p1407_p6, %p1378_p3  ;;  %p1415_p1 = scmp.lt.u32.totalorder %s1406_s28, %s1848_s15 }
  0xd4   : > { %p1414_p10 = por %p1413_p9, %p1412_p4 }
  0xd5   : > { %p1410_p11 = pneg %p1409_p8 }
  0xd6   : > { %p1416_p5 = por %p1415_p1, %p1414_p10 }
  0xd8   : > { %p1417_p12 = pnand %p1416_p5, %p1410_p11 }
  0xda   : > { %1420 = shalt.err (!%p1417_p12)
}
  0xdb   : > { %s1421_s4 = scalar_lea.vmem %s346_s6, 64  ;;  %s1560_s14 = smov [#allocation6]  }
  0xdc   : > { %p1422_p13 = scmp.ne.s32.totalorder %s346_s6, %s1421_s4  ;;  %s1426_s19 = sshll.u32 %s1560_s14, 4  ;;  %s1427_s19 = int_to_ptr.vmem [resolvable:$false] %s1426_s19 }
  0xdd   : > { %s1428_s23 = scalar_lea.vmem %s1427_s19, 128  ;;  %p1429_p8 = scmp.lt.s32.totalorder %s346_s6, %s1427_s19 }
  0xde   : > { %p1424_p0 = pnand %p1422_p13, %p1378_p3  ;;  %p1430_p2 = scmp.lt.s32.totalorder %s1428_s23, %s1421_s4 }
  0xe0   : > { %p1425_p6 = pneg %p1424_p0  ;;  %p1431_p4 = por %p1430_p2, %p1429_p8 }
  0xe2   : > { %p1432_p9 = pnand %p1431_p4, %p1425_p6 }
  0xe4   : > { %1435 = shalt.err (!%p1432_p9)
}
  0xe5   : > { %1134 = dma.hbm_to_vmem [thread:$0]  (!%p1841_p7), %s1848_s15, 64, %s346_s6, %s335_s7  }
  0xe6   : > { %p2053_p11 = scmp.ne.s32.totalorder %s2038_s10, 0 }
  0xe7   : > { %s1901_s18 = sand.u32 (!%p2053_p11), 1, %s1526_s25   ;;  %p2054_p2 = scmp.ne.s32.totalorder (!%p2053_p11), %s2048_s21, 0 }
  0xe8   : > { %354 = sbr.rel (%p2053_p11) target bundleno = 1346 (0x542), region = 48  ;;  %s991_s5 = sshll.u32 (!%p2053_p11), %s1901_s18, 2 }
  0xe9   : > { %s357_s28 = scalar_lea.sflag (!%p2053_p11), [#allocation4], %s1901_s18  ;;  %s1905_s3 = scalar_lea.vmem (!%p2053_p11), [#allocation3], %s991_s5 }
  0xef   : > { %1497 = dma.done.wait (%p2054_p2), %s357_s28, 64  }
  0xf0   : > { %1499 = vsyncadd (%p2054_p2), %s357_s28, 4294967232  ;;  %s365_s22 = sand.u32 1, %s1646_s9   ;;  %s1912_s15 = scalar_lea.vmem [#allocation6], %s991_s5 }
  0xf1   : > { %s366_s10 = scalar_lea.sflag [#allocation7], %s365_s22 }
  0xf2   : > { %1501 = dma.done.wait (%p2054_p2), %s366_s10, 64  }
  0xf3   : > { %1503 = vsyncadd (%p2054_p2), %s366_s10, 4294967232  ;;  %p2055_p7 = scmp.eq.s32.totalorder %s1646_s9, 0 }
  0xf5   : > { %1505 = dma.done.wait (%p2055_p7), [#allocation7], 1024   ;;  %p2056_p3 = pmov %p2055_p7 }
  0xf7   : > { %1507 = vsyncadd (%p2056_p3), [#allocation7], 4294966272  ;;  %p2057_p10 = pmov %p2056_p3 }
  0xf8   : > { %p2058_p1 = pmov %p2056_p3 }
  0xf9   : > { %1509 = dma.done.wait (%p2057_p10), [#allocation10], 2048  }
  0xfa   : > { %1511 = vsyncadd (%p2058_p1), [#allocation10], 4294965248  ;;  %p2059_p5 = pmov %p2058_p1 }
  0xfb   : > { %p2060_p12 = pmov %p2058_p1 }
  0xfc   : > { %1513 = dma.done.wait (%p2059_p5), [#allocation13], 528  }
  0xfd   : > { %1515 = vsyncadd (%p2060_p12), [#allocation13], 4294966768  ;;  %s998_s21 = sshll.u32 %s1901_s18, 3  ;;  %s2061_s7 = sld [smem:[#allocation22_spill]] }
  0xfe   : > { %s1931_s6 = scalar_lea.vmem [#allocation15], %s998_s21 }
 0x103   : > { %p999_p13 = scmp.ne.s32.totalorder %s2061_s7, 0 }
 0x104   : > { %vm430_vm0 = vcmask (!%p999_p13), 261120   ;;  %v1561_v0 = vmov (!%p999_p13), 0.0  }
 0x105   : > { %429 = sbr.rel (%p999_p13) target bundleno = 268 (0x10c), region = 80  ;;  %431 = vst.msk [vmem:[#allocation2] sm:$0xff] (!%p999_p13), %vm430_vm0, %v1561_v0 }
 0x10c PF: > { %s2062_s11 = sld [smem:[#allocation22_spill]]  ;;  %v1562_v1 = vmov 0.0   ;;  %vm1563_vm1 = vmmov 0   ;;  %v433_v6 = vld [vmem:[%s1912_s15] sm:$0xf]  ;;  %vm453_vm2 = vcmask 261120  }
 0x10d   : > { %1052 = vmatprep.subr.bf16.mxu1 %v1562_v1  ;;  %1044 = vmatprep.subr.bf16.mxu0 %v1562_v1  ;;  %v432_v7 = vld [vmem:[%s1905_s3] sm:$0xf]  ;;  %vm619_vm3 = vcmask 130048   ;;  %vm666_vm4 = vcmask 64512   ;;  %vm680_vm5 = vcmask 1043456   ;;  %v727_v47 = vld [vmem:[#allocation2] sm:$0xff] }
 0x10e   : > { %1056 = vmatprep.mubr.msk.bf16.mxu1 %vm1563_vm1, %v1562_v1  ;;  %1048 = vmatprep.mubr.msk.bf16.mxu0 %vm1563_vm1, %v1562_v1 }
 0x112   : > { %s1935_s12 = sshll.u32 %s2062_s11, 4  ;;  %s1028_s4 = sshll.u32 %s2062_s11, 3 }
 0x113   : > { %s499_s9 = scalar_lea.vmem [#allocation9], %s1935_s12  ;;  %s436_s13 = scalar_lea.vmem [#allocation8], %s1935_s12 }
 0x114   : > { %v1225_v2 = vld [vmem:[%s499_s9] sm:$0xff]   ;;  %v1226_v3 = vld [vmem:[%s499_s9 + $0x8] sm:$0xff]   ;;  %s561_s2 = scalar_lea.vmem [#allocation11], %s1935_s12  ;;  %s730_s14 = scalar_lea.vmem [#allocation12], %s1028_s4 }
 0x115   : > { %1053 = vmatpush3.bf16.msra.mxu1 %v1225_v2  ;;  %v1227_v4 = vld [vmem:[%s436_s13] sm:$0xff]   ;;  %v1228_v5 = vld [vmem:[%s436_s13 + $0x8] sm:$0xff]   ;;  %p1019_p0 = scmp.ne.s32.totalorder %s2062_s11, 3 }
 0x116   : > { %1054 = vmatprep.subr.bf16.mxu1 %v1562_v1  ;;  %1045 = vmatpush3.bf16.msra.mxu0 %v1227_v4  ;;  %v1229_v8 = vld [vmem:[%s561_s2] sm:$0xff]   ;;  %v1230_v9 = vld [vmem:[%s561_s2 + $0x8] sm:$0xff]   ;;  %v1020_v54 = vld [vmem:[#allocation14] ss:$0 sm:$0xff] (!%p1019_p0) }
 0x117   : > { %1046 = vmatprep.subr.bf16.mxu0 %v1562_v1  ;;  %v1231_v38 = vld [vmem:[%s730_s14] sm:$0xff]  }
 0x119   : > { %1055 = vmatpush3.bf16.msra.mxu1 %v1226_v3 }
 0x11a   : > { %1068 = vmatprep.subr.bf16.mxu1 %v1562_v1  ;;  %1047 = vmatpush3.bf16.msra.mxu0 %v1228_v5 }
 0x11b   : > { %1060 = vmatprep.subr.bf16.mxu0 %v1562_v1 }
 0x11c   : > { %1057 = vmatmul.mubr.msk.bf16.vlgmr.msra.gmra.mrb[0].mxu1 %vm453_vm2, %v433_v6 }
 0x11d   : > { %1070 = vmatprep.mubr.msk.bf16.mxu1 %vm1563_vm1, %v1562_v1  ;;  %1049 = vmatmul.mubr.msk.bf16.vlgmr.msra.gmra.mrb[0].mxu0 %vm453_vm2, %v432_v7 }
 0x11e   : > { %1064 = vmatprep.mubr.msk.bf16.mxu0 %vm1563_vm1, %v1562_v1  ;;  %1061 = vmatpush3.bf16.msra.mxu0 %v1229_v8 }
 0x11f   : > { %1062 = vmatprep.subr.bf16.mxu0 %v1562_v1 }
 0x122   : > { %1063 = vmatpush3.bf16.msra.mxu0 %v1230_v9 }
 0x123   : > { %1074 = vmatprep.subr.bf16.mxu0 %v1562_v1 }
 0x125   : > { %1065 = vmatmul.mubr.msk.bf16.vlgmr.msra.gmra.mrb[4].mxu0 %vm453_vm2, %v433_v6 }
 0x126   : > { %1076 = vmatprep.mubr.msk.bf16.mxu0 %vm1563_vm1, %v1562_v1 }
 0x1ef   : > { %v553_v10 = vpop.f32.mrb[0].mxu1 }
 0x1f0   : > { %v559_v11 = vpack.c.bf16 %v553_v10, %v553_v10  ;;  %v1058_v12 = vpop.f32.mrb[1].mxu1  ;;  %v491_v14 = vpop.f32.mrb[0].mxu0 }
 0x1f1   : > { %v556_v13 = vpop.f32.mrb[2].mxu1  ;;  %v1050_v17 = vpop.f32.mrb[1].mxu0  ;;  %v497_v20 = vpack.c.bf16 %v491_v14, %v491_v14 }
 0x1f2   : > { %v624_v15 = vsel %vm619_vm3, %v559_v11, 0  ;;  %v1059_v16 = vpop.f32.mrb[3].mxu1  ;;  %v494_v18 = vpop.f32.mrb[2].mxu0 }
 0x1f3   : > { %1069 = vmatpush3.bf16.xpose.msra.mxu1 %v624_v15  ;;  %v1051_v19 = vpop.f32.mrb[3].mxu0 }
 0x1f4   : > { %1080 = vmatprep.subr.bf16.mxu1 %v1562_v1 }
 0x1f8   : > { %v612_v26 = vpop.f32.mrb[4].mxu0 }
 0x1f9   : > { %v618_v27 = vpack.c.bf16 %v612_v26, %v612_v26  ;;  %v1066_v28 = vpop.f32.mrb[5].mxu0 }
 0x1fa   : > { %1071 = vmatmul.mubr.msk.bf16.vlgmr.msra.gmra.mrb[4].mxu1 %vm619_vm3, %v497_v20  ;;  %v615_v29 = vpop.f32.mrb[6].mxu0 }
 0x1fb   : > { %1082 = vmatprep.mubr.msk.bf16.mxu1 %vm1563_vm1, %v1562_v1  ;;  %v682_v30 = vsel %vm680_vm5, %v618_v27, 0  ;;  %v1067_v31 = vpop.f32.mrb[7].mxu0  ;;  %1081 = vmatpush3.bf16.msra.mxu1 %v1231_v38 }
 0x1fc   : > { %1075 = vmatpush3.bf16.msra.mxu0 %v682_v30 }
 0x2cd   : > { %v660_v21 = vpop.f32.mrb[4].mxu1 }
 0x2ce   : > { %v1072_v22 = vpop.f32.mrb[5].mxu1  ;;  %v667_v23 = vsel %vm666_vm4, %v660_v21, -inf }
 0x2cf   : > { %668 = vmax.xlane.f32.xlu0 %v667_v23  ;;  %v663_v24 = vpop.f32.mrb[6].mxu1 }
 0x2d0   : > { %v1073_v25 = vpop.f32.mrb[7].mxu1 }
 0x35c   : > { %v669_v32 = vpop.xlane.xlu0 %668 }
 0x35d   : > { %v670_v33 = vsub.f32 %v660_v21, %v669_v32 }
 0x35f   : > { %v671_v34 = vmul.f32 1.442695, %v670_v33 }
 0x361   : > { %1232 = vpow2.f32 %v671_v34 }
 0x36b   : > { %v1233_v35 = vpop.eup %1232 }
 0x36c   : > { %v673_v36 = vsel %vm666_vm4, %v1233_v35, 0.0  ;;  %v676_v37 = vpack.c.bf16 %v1233_v35, %v1233_v35 }
 0x36d   : > { %674 = vadd.xlane.f32.xlu0 %v673_v36 }
 0x36e   : > { %1077 = vmatmul.mubr.msk.bf16.vlgmr.msra.gmra.mrb[8].mxu0 %vm666_vm4, %v676_v37 }
 0x3fa   : > { %v675_v39 = vpop.xlane.xlu0 %674 }
 0x3fb   : > { %1234 = vrcp.f32 %v675_v39 }
 0x405   : > { %v1235_v40 = vpop.eup %1234 }
 0x441   : > { %v718_v41 = vpop.f32.mrb[8].mxu0 }
 0x442   : > { %v725_v42 = vmul.f32 %v1235_v40, %v718_v41  ;;  %v1078_v43 = vpop.f32.mrb[9].mxu0 }
 0x443   : > { %v721_v44 = vpop.f32.mrb[10].mxu0 }
 0x444   : > { %v726_v45 = vpack.c.bf16 %v725_v42, %v725_v42  ;;  %v1079_v46 = vpop.f32.mrb[11].mxu0 }
 0x446   : > { %1083 = vmatmul.mubr.msk.bf16.vlgmr.msra.gmra.mrb[8].mxu1 %vm619_vm3, %v726_v45 }
 0x516   : > { %787 = sbr.rel (%p1019_p0) target bundleno = 1319 (0x527), region = 84 }
 0x519   : > { %v776_v48 = vpop.f32.mrb[8].mxu1 }
 0x51a   : > { %v782_v49 = vadd.f32 %v776_v48, %v727_v47  ;;  %v1084_v50 = vpop.f32.mrb[9].mxu1 }
 0x51b   : > { %v779_v51 = vpop.f32.mrb[10].mxu1 }
 0x51c   : > { %783 = vst.msk [vmem:[#allocation2] sm:$0xff] %vm453_vm2, %v782_v49  ;;  %v1085_v52 = vpop.f32.mrb[11].mxu1 }
 0x523   : > { %v788_v53 = vld [vmem:[#allocation2] sm:$0xff] }
 0x524   : > { %v796_v55 = vadd.f32 %v1020_v54, %v788_v53 }
 0x526   : > { %797 = vst.msk [vmem:[%s1931_s6] sm:$0xff] %vm453_vm2, %v796_v55 }
 0x527 PF: > { %s2063_s19 = sld [smem:[#allocation23_spill]]  ;;  %s2064_s3 = sld [smem:[#allocation30_spill]] }
 0x528   : > { %s813_s10 = sshll.u32 %s1931_s6, 4  ;;  %s799_s15 = scalar_lea.sflag [#allocation5], %s1901_s18  ;;  %s814_s10 = int_to_ptr.vmem [resolvable:$true] %s813_s10 }
 0x529   : > { %s1436_s21 = scalar_lea.vmem %s814_s10, 128  ;;  %p2065_p8 = scmp.ne.s32.totalorder %s2050_s27, 0 }
 0x52a   : > { %p1437_p6 = scmp.ne.s32.totalorder %s814_s10, %s1436_s21  ;;  %s1564_s7 = smov [#allocation15]  }
 0x52b   : > { %s1440_s11 = sshll.u32 %s1564_s7, 4  ;;  %s1441_s11 = int_to_ptr.vmem [resolvable:$false] %s1440_s11 }
 0x52c   : > { %p1438_p4 = pnand %p1437_p6, %p2065_p8  ;;  %s1442_s12 = scalar_lea.vmem %s1441_s11, 256 }
 0x52d   : > { %s1022_s23 = sshll.u32 %s2063_s19, 7  ;;  %p1443_p11 = scmp.lt.s32.totalorder %s814_s10, %s1441_s11 }
 0x52e   : > { %s1966_s22 = scalar_lea.hbm %s2064_s3, %s1022_s23  ;;  %p1439_p9 = pneg %p1438_p4 }
 0x52f   : > { %p1444_p2 = scmp.lt.s32.totalorder %s1442_s12, %s1436_s21 }
 0x531   : > { %p1445_p7 = por %p1444_p2, %p1443_p11 }
 0x533   : > { %p1446_p3 = pnand %p1445_p7, %p1439_p9 }
 0x535   : > { %1449 = shalt.err (!%p1446_p3)
}
 0x536   : > { %s1450_s18 = scalar_lea.hbm %s1966_s22, 128  ;;  %s1454_s13 = scalar_lea.hbm %s2064_s3, 256 }
 0x537   : > { %p1451_p10 = scmp.ne.s32.totalorder %s1966_s22, %s1450_s18  ;;  %p1455_p12 = scmp.lt.u32.totalorder %s1966_s22, %s2064_s3 }
 0x538   : > { %p1456_p13 = scmp.lt.u32.totalorder %s1454_s13, %s1450_s18  ;;  %p1458_p6 = scmp.lt.u32.totalorder %s1450_s18, %s1966_s22 }
 0x539   : > { %p1452_p1 = pnand %p1451_p10, %p2065_p8 }
 0x53a   : > { %p1457_p0 = por %p1456_p13, %p1455_p12 }
 0x53b   : > { %p1453_p5 = pneg %p1452_p1 }
 0x53c   : > { %p1459_p4 = por %p1458_p6, %p1457_p0 }
 0x53e   : > { %p1460_p9 = pnand %p1459_p4, %p1453_p5 }
 0x540   : > { %1463 = shalt.err (!%p1460_p9)
}
 0x541   : > { %1110 = dma.vmem_to_hbm [thread:$0]  (%p2065_p8), %s814_s10, 128, %s1966_s22, %s799_s15  }
 0x542 PF: > { %p1150_p11 = scmp.ge.s32.totalorder %s1550_s8, 2  ;;  %s825_s14 = sand.u32 1, %s1522_s24  }
 0x543   : > { %p2066_p2 = scmp.ne.s32.totalorder %s2051_s20, 0  ;;  %s826_s19 = scalar_lea.sflag [#allocation5], %s825_s14 }
 0x545   : > { %p1136_p7 = pnand %p1150_p11, %p2066_p2 }
 0x547   : > { %1517 = dma.done.wait (!%p1136_p7), %s826_s19, 128  }
 0x548   : > { %1519 = vsyncadd (!%p1136_p7), %s826_s19, 4294967168  ;;  %s28_s8 = sadd.s32 1, %s1550_s8   ;;  %s2067_s23 = sld [smem:[#allocation24_spill]] }
 0x549   : > { %p25_p3 = scmp.ge.s32.totalorder %s28_s8, 10   ;;  %s2068_s24 = smov %s1526_s25 }
 0x54a   : > { %s2069_s25 = smov %s1530_s26  ;;  %s2070_s26 = smov %s1828_s16 }
 0x54b   : > { %s2071_s27 = smov %s1542_s29  ;;  %s2072_s28 = smov %s1546_s30 }
 0x54c   : > { %s2073_s29 = smov %s2076_s17  ;;  %27 = sbr.rel (!%p25_p3) target bundleno = 18 (0x12), region = 138 }
 0x54e   : > { %s2074_s30 = smov %s2067_s23 }
 0x553   :  { %831 = vsyncpa [#allocation4], 1 }
 0x554   :  { %833 = vsyncpa [#allocation4 + $0x1], 1 }
 0x555   :  { %834 = vsyncpa [#allocation7], 1 }
 0x556   :  { %836 = vsyncpa [#allocation7 + $0x1], 1 }
 0x557   :  { %837 = vsyncpa [#allocation10], 1 }
 0x558   :  { %838 = vsyncpa [#allocation13], 1 }
 0x559   :  { %839 = vsyncpa [#allocation5], 1 }
 0x55a   :  { %841 = vsyncpa [#allocation5 + $0x1], 1 }

// kernel: tpu_custom_call.1
= control target key start
LH: loop header
LB: loop body
LE: loop exit
PB: predicated region body
PF: predicated region fallthrough
CT: control target
= control target key end

     0   :  { %s2015_s0 = inlined_call_operand.hbm [shape: bf16[2,8,32], index: 0, kind: input, shape index: {}]   ;;  %s2016_s1 = inlined_call_operand.hbm [shape: bf16[2,8,32], index: 1, kind: input, shape index: {}]   ;;  %s2017_s2 = inlined_call_operand.hbm [shape: bf16[4,32,16], index: 2, kind: input, shape index: {}]   ;;  %s2018_s3 = inlined_call_operand.hbm [shape: bf16[4,32,16], index: 3, kind: input, shape index: {}]   ;;  %s2019_s4 = inlined_call_operand.hbm [shape: bf16[4,32,16], index: 4, kind: input, shape index: {}]   ;;  %s2020_s5 = inlined_call_operand.hbm [shape: bf16[4,16,32], index: 5, kind: input, shape index: {}]   ;;  %s2021_s6 = inlined_call_operand.hbm [shape: f32[1,32], index: 6, kind: input, shape index: {}]   ;;  %s2022_s7 = inlined_call_operand.hbm [shape: f32[2,8,32], index: 7, kind: output, shape index: {}]  }
   0x1   :  { %2030 = sst [smem:[#allocation25_spill]] %s2017_s2 }
   0x2   :  { %2031 = sst [smem:[#allocation26_spill]] %s2018_s3 }
   0x3   :  { %2032 = sst [smem:[#allocation27_spill]] %s2019_s4 }
   0x4   :  { %2033 = sst [smem:[#allocation28_spill]] %s2020_s5 }
   0x5   :  { %2034 = sst [smem:[#allocation29_spill]] %s2021_s6 }
   0x6   :  { %2035 = sst [smem:[#allocation30_spill]] %s2022_s7 }
   0x7   :  { %12 = vsyncpa [#allocation4], 0 }
   0x8   :  { %14 = vsyncpa [#allocation4 + $0x1], 0 }
   0x9   :  { %15 = vsyncpa [#allocation7], 0 }
   0xa   :  { %17 = vsyncpa [#allocation7 + $0x1], 0 }
   0xb   :  { %18 = vsyncpa [#allocation10], 0 }
   0xc   :  { %19 = vsyncpa [#allocation13], 0 }
   0xd   :  { %20 = vsyncpa [#allocation5], 0 }
   0xe   :  { %22 = vsyncpa [#allocation5 + $0x1], 0  ;;  %s1605_s24 = smov 0   ;;  %s1607_s25 = smov 0  }
   0xf   :  { %s1609_s26 = smov 0   ;;  %s1611_s27 = smov 0  }
  0x10   :  { %s1613_s28 = smov 0   ;;  %s1615_s29 = smov 0  }
  0x11   :  { %s1617_s30 = smov 0   ;;  %s1619_s8 = smov 0  }
  0x12 LB: > { %2036 = sst [smem:[#allocation22_spill]] %s1534_s27  ;;  %s1646_s9 = sadd.s32 4294967295, %s1550_s8   ;;  %s1550_s8 = sphi %s1619_s8, %s28_s8   ;;  %s1546_s30 = sphi %s1617_s30, %s2074_s30   ;;  %s1542_s29 = sphi %s1615_s29, %s2073_s29   ;;  %s1538_s28 = sphi %s1613_s28, %s2072_s28   ;;  %s1534_s27 = sphi %s1611_s27, %s2071_s27   ;;  %s1530_s26 = sphi %s1609_s26, %s2070_s26   ;;  %s1526_s25 = sphi %s1607_s25, %s2069_s25   ;;  %s1522_s24 = sphi %s1605_s24, %s2068_s24  }
  0x13   : > { %2037 = sst [smem:[#allocation23_spill]] %s1538_s28  ;;  %p979_p0 = scmp.ge.s32.totalorder %s1550_s8, 1 }
  0x14   : > { %p2025_p1 = scmp.eq.s32.totalorder %s1646_s9, 0  ;;  %p239_p2 = scmp.lt.s32.totalorder %s1550_s8, 9 }
  0x15   : > { %s1552_s11 = smov [#allocation8]   ;;  %s1553_s14 = smov [#allocation9]  }
  0x16   : > { %p1651_p3 = pnand %p979_p0, %p239_p2  ;;  %s251_s12 = sshll.u32 %s1552_s11, 4  ;;  %s1655_s12 = int_to_ptr.vmem [resolvable:$true] %s251_s12 }
  0x17   : > { %s264_s15 = sshll.u32 %s1553_s14, 4  ;;  %s1554_s16 = smov [#allocation12]   ;;  %s1665_s15 = int_to_ptr.vmem [resolvable:$true] %s264_s15 }
  0x18   : > { %s2038_s10 = scalar_select %p1651_p3, 1, 0 }
  0x19   : > { %p1112_p4 = pneg %p1651_p3  ;;  %s1667_s17 = sshll.u32 %s1554_s16, 4  ;;  %s291_s17 = int_to_ptr.vmem [resolvable:$true] %s1667_s17 }
  0x1a   : > { %s2040_s2 = sld [smem:[#allocation25_spill]] }
  0x1b   : > { %p1661_p5 = pnand %p1112_p4, %p2025_p1 }
  0x1d   : > { %p1677_p7 = pneg %p1661_p5 }
  0x20   : > { %s1236_s20 = scalar_lea.hbm %s2040_s2, 1024 }
  0x21   : > { %p1237_p6 = scmp.ne.s32.totalorder %s2040_s2, %s1236_s20  ;;  %p1243_p10 = scmp.lt.u32.totalorder %s1236_s20, %s2040_s2 }
  0x23   : > { %p1239_p8 = pnand %p1677_p7, %p1237_p6 }
  0x25   : > { %p1240_p9 = pneg %p1239_p8 }
  0x27   : > { %p1245_p11 = pnand %p1243_p10, %p1240_p9 }
  0x29   : > { %1248 = shalt.err (!%p1245_p11)
}
  0x2a   : > { %s1249_s16 = scalar_lea.vmem %s1655_s12, 1024  ;;  %p1257_p2 = scmp.lt.s32.totalorder %s1655_s12, %s1655_s12 }
  0x2b   : > { %p1250_p12 = scmp.ne.s32.totalorder %s1655_s12, %s1249_s16  ;;  %p1258_p4 = scmp.lt.s32.totalorder %s1249_s16, %s1249_s16 }
  0x2d   : > { %p1252_p13 = pnand %p1250_p12, %p1677_p7  ;;  %p1259_p6 = por %p1258_p4, %p1257_p2 }
  0x2f   : > { %p1253_p0 = pneg %p1252_p13 }
  0x31   : > { %p1260_p8 = pnand %p1259_p6, %p1253_p0 }
  0x33   : > { %1263 = shalt.err (!%p1260_p8)
}
  0x34   : > { %s1555_s18 = smov 64   ;;  %s1556_s19 = smov 4  }
  0x35   : > { %1115 = dma.hbm_to_vmem [thread:$0]  (!%p1661_p5), %s2040_s2, 1024, %s1655_s12, [#allocation7], %s1555_s18, %s1555_s18, %s1556_s19  }
  0x36   : > { %s2042_s3 = sld [smem:[#allocation26_spill]] }
  0x3c   : > { %s1264_s14 = scalar_lea.hbm %s2042_s3, 1024 }
  0x3d   : > { %p1265_p9 = scmp.ne.s32.totalorder %s2042_s3, %s1264_s14  ;;  %p1271_p12 = scmp.lt.u32.totalorder %s1264_s14, %s2042_s3 }
  0x3f   : > { %p1267_p10 = pnand %p1265_p9, %p1677_p7 }
  0x41   : > { %p1268_p11 = pneg %p1267_p10 }
  0x43   : > { %p1273_p13 = pnand %p1271_p12, %p1268_p11 }
  0x45   : > { %1276 = shalt.err (!%p1273_p13)
}
  0x46   : > { %s1277_s12 = scalar_lea.vmem %s1665_s15, 1024  ;;  %p1285_p6 = scmp.lt.s32.totalorder %s1665_s15, %s1665_s15 }
  0x47   : > { %p1278_p0 = scmp.ne.s32.totalorder %s1665_s15, %s1277_s12  ;;  %p1286_p8 = scmp.lt.s32.totalorder %s1277_s12, %s1277_s12 }
  0x49   : > { %p1280_p2 = pnand %p1278_p0, %p1677_p7  ;;  %p1287_p9 = por %p1286_p8, %p1285_p6 }
  0x4b   : > { %p1281_p4 = pneg %p1280_p2 }
  0x4d   : > { %p1288_p10 = pnand %p1287_p9, %p1281_p4 }
  0x4f   : > { %1291 = shalt.err (!%p1288_p10)
}
  0x50   : > { %1118 = dma.hbm_to_vmem [thread:$0]  (!%p1661_p5), %s2042_s3, 1024, %s1665_s15, [#allocation10], %s1555_s18, %s1555_s18, %s1556_s19  }
  0x51   : > { %s2043_s5 = sld [smem:[#allocation28_spill]] }
  0x57   : > { %s1292_s21 = scalar_lea.hbm %s2043_s5, 512 }
  0x58   : > { %p1293_p11 = scmp.ne.s32.totalorder %s2043_s5, %s1292_s21  ;;  %p1299_p0 = scmp.lt.u32.totalorder %s1292_s21, %s2043_s5 }
  0x5a   : > { %p1295_p12 = pnand %p1293_p11, %p1677_p7 }
  0x5c   : > { %p1296_p13 = pneg %p1295_p12 }
  0x5e   : > { %p1301_p2 = pnand %p1299_p0, %p1296_p13 }
  0x60   : > { %1304 = shalt.err (!%p1301_p2)
}
  0x61   : > { %s1305_s12 = scalar_lea.vmem %s291_s17, 512  ;;  %p1313_p9 = scmp.lt.s32.totalorder %s291_s17, %s291_s17 }
  0x62   : > { %p1306_p4 = scmp.ne.s32.totalorder %s291_s17, %s1305_s12  ;;  %p1314_p10 = scmp.lt.s32.totalorder %s1305_s12, %s1305_s12 }
  0x64   : > { %p1308_p6 = pnand %p1306_p4, %p1677_p7  ;;  %p1315_p1 = por %p1314_p10, %p1313_p9 }
  0x66   : > { %p1309_p8 = pneg %p1308_p6 }
  0x68   : > { %p1316_p3 = pnand %p1315_p1, %p1309_p8 }
  0x6a   : > { %1319 = shalt.err (!%p1316_p3)
}
  0x6b   : > { %1124 = dma.hbm_to_vmem [thread:$0]  (!%p1661_p5), %s2043_s5, 512, %s291_s17, [#allocation13], %s1555_s18, %s1555_s18, %s1556_s19  }
  0x6c   : > { %s1557_s27 = smov [#allocation11]   ;;  %s1558_s20 = smov [#allocation14]  }
  0x6d   : > { %s277_s28 = sshll.u32 %s1557_s27, 4  ;;  %s304_s21 = sshll.u32 %s1558_s20, 4  ;;  %s278_s28 = int_to_ptr.vmem [resolvable:$true] %s277_s28  ;;  %s305_s21 = int_to_ptr.vmem [resolvable:$true] %s304_s21 }
  0x6e   : > { %s2044_s4 = sld [smem:[#allocation27_spill]] }
  0x74   : > { %s1320_s14 = scalar_lea.hbm %s2044_s4, 1024 }
  0x75   : > { %p1321_p1 = scmp.ne.s32.totalorder %s2044_s4, %s1320_s14  ;;  %p1327_p12 = scmp.lt.u32.totalorder %s1320_s14, %s2044_s4 }
  0x77   : > { %p1323_p3 = pnand %p1321_p1, %p1677_p7 }
  0x79   : > { %p1324_p11 = pneg %p1323_p3 }
  0x7b   : > { %p1329_p13 = pnand %p1327_p12, %p1324_p11 }
  0x7d   : > { %1332 = shalt.err (!%p1329_p13)
}
  0x7e   : > { %s1333_s17 = scalar_lea.vmem %s278_s28, 1024  ;;  %p1341_p6 = scmp.lt.s32.totalorder %s278_s28, %s278_s28 }
  0x7f   : > { %p1334_p0 = scmp.ne.s32.totalorder %s278_s28, %s1333_s17  ;;  %p1342_p8 = scmp.lt.s32.totalorder %s1333_s17, %s1333_s17 }
  0x81   : > { %p1336_p2 = pnand %p1334_p0, %p1677_p7  ;;  %p1343_p9 = por %p1342_p8, %p1341_p6 }
  0x83   : > { %p1337_p4 = pneg %p1336_p2 }
  0x85   : > { %p1344_p10 = pnand %p1343_p9, %p1337_p4 }
  0x87   : > { %1347 = shalt.err (!%p1344_p10)
}
  0x88   : > { %1121 = dma.hbm_to_vmem [thread:$0]  (!%p1661_p5), %s2044_s4, 1024, %s278_s28, [#allocation10], %s1555_s18, %s1555_s18, %s1556_s19  }
  0x89   : > { %s2045_s6 = sld [smem:[#allocation29_spill]] }
  0x8f   : > { %s1348_s22 = scalar_lea.hbm %s2045_s6, 16 }
  0x90   : > { %p1349_p1 = scmp.ne.s32.totalorder %s2045_s6, %s1348_s22  ;;  %p1355_p12 = scmp.lt.u32.totalorder %s1348_s22, %s2045_s6 }
  0x92   : > { %p1351_p3 = pnand %p1349_p1, %p1677_p7 }
  0x94   : > { %p1352_p11 = pneg %p1351_p3 }
  0x96   : > { %p1357_p13 = pnand %p1355_p12, %p1352_p11 }
  0x98   : > { %1360 = shalt.err (!%p1357_p13)
}
  0x99   : > { %s1361_s15 = scalar_lea.vmem %s305_s21, 16  ;;  %s1368_s18 = scalar_lea.vmem %s305_s21, 32 }
  0x9a   : > { %p1362_p0 = scmp.ne.s32.totalorder %s305_s21, %s1361_s15  ;;  %p1369_p6 = scmp.lt.s32.totalorder %s305_s21, %s305_s21 }
  0x9b   : > { %p1370_p8 = scmp.lt.s32.totalorder %s1368_s18, %s1361_s15 }
  0x9c   : > { %p1364_p2 = pnand %p1362_p0, %p1677_p7 }
  0x9d   : > { %p1371_p9 = por %p1370_p8, %p1369_p6 }
  0x9e   : > { %p1365_p4 = pneg %p1364_p2 }
  0xa0   : > { %p1372_p10 = pnand %p1371_p9, %p1365_p4 }
  0xa2   : > { %1375 = shalt.err (!%p1372_p10)
}
  0xa3   : > { %1127 = dma.hbm_to_vmem [thread:$0]  (!%p1661_p5), %s2045_s6, 16, %s305_s21, [#allocation13]  }
  0xa4   : > { %s978_s23 = sadd.s32 4294967294, %s1550_s8   ;;  %s40_s17 = sadd.s32 1, %s1542_s29 }
  0xa5   : > { %s47_s2 = sadd.s32 1, %s1546_s30  ;;  %p41_p7 = scmp.ge.s32.totalorder %s40_s17, 4 }
  0xa6   : > { %s56_s13 = sadd.s32 1, %s1530_s26  ;;  %p63_p1 = scmp.ne.s32.totalorder %s1530_s26, %s1526_s25 }
  0xa7   : > { %p64_p3 = scmp.eq.s32.totalorder %s1550_s8, 0  ;;  %s2076_s17 = smov (%p41_p7, %s40_s17), 0 }
  0xa8   : > { %s2078_s2 = smov (!%p41_p7, %s47_s2), %s1546_s30  ;;  %p69_p5 = scmp.ne.s32.totalorder %s1526_s25, %s1522_s24 }
  0xa9   : > { %p1798_p11 = por %p64_p3, %p63_p1  ;;  %p49_p12 = scmp.ge.s32.totalorder %s2078_s2, 2 }
  0xaa   : > { %p226_p13 = scmp.eq.s32.totalorder %s1646_s9, 7  ;;  %p2047_p0 = scmp.eq.s32.totalorder %s1646_s9, 0 }
  0xab   : > { %p232_p4 = scmp.eq.s32.totalorder %s978_s23, 7  ;;  %s2080_s2 = smov (%p49_p12, %s2078_s2), 0 }
  0xac   : > { %p1807_p2 = por %p2047_p0, %p69_p5  ;;  %2049 = sst [smem:[#allocation24_spill]] %s2080_s2 }
  0xad   : > { %p1813_p6 = por %p226_p13, %p63_p1  ;;  %p1817_p8 = por %p232_p4, %p69_p5 }
  0xae   : > { %s2048_s21 = scalar_select %p1807_p2, 1, 0 }
  0xaf   : > { %s2050_s27 = scalar_select %p1813_p6, 1, 0 }
  0xb0   : > { %s2051_s20 = scalar_select %p1817_p8, 1, 0 }
  0xb1   : > { %s51_s22 = ssub.s32 %s1546_s30, %s2080_s2  ;;  %p1144_p9 = scmp.lt.s32.totalorder %s1550_s8, 8 }
  0xb2   : > { %p54_p10 = scmp.eq.s32.totalorder %s51_s22, 0  ;;  %s315_s11 = sand.u32 1, %s1530_s26  }
  0xb3   : > { %s1825_s14 = sshll.u32 %s315_s11, 2  ;;  %s987_s12 = sshll.u32 %s1546_s30, 6 }
  0xb4   : > { %s1828_s16 = scalar_select %p54_p10, %s1530_s26, %s56_s13  }
  0xb5   : > { %s1834_s19 = scalar_lea.hbm %s2015_s0, %s987_s12  ;;  %s319_s28 = scalar_lea.vmem [#allocation3], %s1825_s14 }
  0xb6   : > { %s327_s23 = sshll.u32 %s319_s28, 4  ;;  %p1841_p7 = pnand %p1144_p9, %p1798_p11  ;;  %s1837_s23 = int_to_ptr.vmem [resolvable:$true] %s327_s23 }
  0xb7   : > { %s1848_s15 = scalar_lea.hbm %s2016_s1, %s987_s12  ;;  %s334_s18 = sand.u32 1, %s1550_s8  }
  0xb8   : > { %s316_s4 = scalar_lea.sflag [#allocation4], %s315_s11  ;;  %s1376_s5 = scalar_lea.hbm %s1834_s19, 64 }
  0xb9   : > { %p1377_p1 = scmp.ne.s32.totalorder %s1834_s19, %s1376_s5  ;;  %p1378_p3 = pneg %p1841_p7 }
  0xba   : > { %s1381_s6 = scalar_lea.hbm %s2015_s0, 128  ;;  %p1382_p12 = scmp.lt.u32.totalorder %s1834_s19, %s2015_s0 }
  0xbb   : > { %p1379_p5 = pnand %p1378_p3, %p1377_p1  ;;  %p1383_p13 = scmp.lt.u32.totalorder %s1381_s6, %s1376_s5 }
  0xbc   : > { %p1385_p4 = scmp.lt.u32.totalorder %s1376_s5, %s1834_s19 }
  0xbd   : > { %p1380_p11 = pneg %p1379_p5  ;;  %p1384_p0 = por %p1383_p13, %p1382_p12 }
  0xbf   : > { %p1386_p9 = por %p1385_p4, %p1384_p0 }
  0xc1   : > { %p1387_p10 = pnand %p1386_p9, %p1380_p11 }
  0xc3   : > { %1390 = shalt.err (!%p1387_p10)
}
  0xc4   : > { %s1391_s11 = scalar_lea.vmem %s1837_s23, 64  ;;  %s1559_s12 = smov [#allocation3]  }
  0xc5   : > { %p1392_p1 = scmp.ne.s32.totalorder %s1837_s23, %s1391_s11  ;;  %s1396_s13 = sshll.u32 %s1559_s12, 4  ;;  %s1397_s13 = int_to_ptr.vmem [resolvable:$false] %s1396_s13 }
  0xc6   : > { %s1398_s2 = scalar_lea.vmem %s1397_s13, 128  ;;  %p1399_p6 = scmp.lt.s32.totalorder %s1837_s23, %s1397_s13 }
  0xc7   : > { %p1394_p5 = pnand %p1392_p1, %p1378_p3  ;;  %p1400_p12 = scmp.lt.s32.totalorder %s1398_s2, %s1391_s11 }
  0xc9   : > { %p1395_p8 = pneg %p1394_p5  ;;  %p1401_p13 = por %p1400_p12, %p1399_p6 }
  0xcb   : > { %p1402_p0 = pnand %p1401_p13, %p1395_p8 }
  0xcd   : > { %1405 = shalt.err (!%p1402_p0)
}
  0xce   : > { %1131 = dma.hbm_to_vmem [thread:$0]  (!%p1841_p7), %s1834_s19, 64, %s1837_s23, %s316_s4  }
  0xcf   : > { %s338_s5 = scalar_lea.vmem [#allocation6], %s1825_s14  ;;  %s335_s7 = scalar_lea.sflag [#allocation7], %s334_s18 }
  0xd0   : > { %s345_s6 = sshll.u32 %s338_s5, 4  ;;  %s1406_s28 = scalar_lea.hbm %s1848_s15, 64  ;;  %s346_s6 = int_to_ptr.vmem [resolvable:$true] %s345_s6 }
  0xd1   : > { %p1407_p6 = scmp.ne.s32.totalorder %s1848_s15, %s1406_s28  ;;  %s1411_s12 = scalar_lea.hbm %s2016_s1, 128 }
  0xd2   : > { %p1412_p4 = scmp.lt.u32.totalorder %s1848_s15, %s2016_s1  ;;  %p1413_p9 = scmp.lt.u32.totalorder %s1411_s12, %s1406_s28 }
  0xd3   : > { %p1409_p8 = pnand %p1407_p6, %p1378_p3  ;;  %p1415_p1 = scmp.lt.u32.totalorder %s1406_s28, %s1848_s15 }
  0xd4   : > { %p1414_p10 = por %p1413_p9, %p1412_p4 }
  0xd5   : > { %p1410_p11 = pneg %p1409_p8 }
  0xd6   : > { %p1416_p5 = por %p1415_p1, %p1414_p10 }
  0xd8   : > { %p1417_p12 = pnand %p1416_p5, %p1410_p11 }
  0xda   : > { %1420 = shalt.err (!%p1417_p12)
}
  0xdb   : > { %s1421_s4 = scalar_lea.vmem %s346_s6, 64  ;;  %s1560_s14 = smov [#allocation6]  }
  0xdc   : > { %p1422_p13 = scmp.ne.s32.totalorder %s346_s6, %s1421_s4  ;;  %s1426_s19 = sshll.u32 %s1560_s14, 4  ;;  %s1427_s19 = int_to_ptr.vmem [resolvable:$false] %s1426_s19 }
  0xdd   : > { %s1428_s23 = scalar_lea.vmem %s1427_s19, 128  ;;  %p1429_p8 = scmp.lt.s32.totalorder %s346_s6, %s1427_s19 }
  0xde   : > { %p1424_p0 = pnand %p1422_p13, %p1378_p3  ;;  %p1430_p2 = scmp.lt.s32.totalorder %s1428_s23, %s1421_s4 }
  0xe0   : > { %p1425_p6 = pneg %p1424_p0  ;;  %p1431_p4 = por %p1430_p2, %p1429_p8 }
  0xe2   : > { %p1432_p9 = pnand %p1431_p4, %p1425_p6 }
  0xe4   : > { %1435 = shalt.err (!%p1432_p9)
}
  0xe5   : > { %1134 = dma.hbm_to_vmem [thread:$0]  (!%p1841_p7), %s1848_s15, 64, %s346_s6, %s335_s7  }
  0xe6   : > { %p2053_p11 = scmp.ne.s32.totalorder %s2038_s10, 0 }
  0xe7   : > { %s1901_s18 = sand.u32 (!%p2053_p11), 1, %s1526_s25   ;;  %p2054_p2 = scmp.ne.s32.totalorder (!%p2053_p11), %s2048_s21, 0 }
  0xe8   : > { %354 = sbr.rel (%p2053_p11) target bundleno = 1346 (0x542), region = 48  ;;  %s991_s5 = sshll.u32 (!%p2053_p11), %s1901_s18, 2 }
  0xe9   : > { %s357_s28 = scalar_lea.sflag (!%p2053_p11), [#allocation4], %s1901_s18  ;;  %s1905_s3 = scalar_lea.vmem (!%p2053_p11), [#allocation3], %s991_s5 }
  0xef   : > { %1497 = dma.done.wait (%p2054_p2), %s357_s28, 64  }
  0xf0   : > { %1499 = vsyncadd (%p2054_p2), %s357_s28, 4294967232  ;;  %s365_s22 = sand.u32 1, %s1646_s9   ;;  %s1912_s15 = scalar_lea.vmem [#allocation6], %s991_s5 }
  0xf1   : > { %s366_s10 = scalar_lea.sflag [#allocation7], %s365_s22 }
  0xf2   : > { %1501 = dma.done.wait (%p2054_p2), %s366_s10, 64  }
  0xf3   : > { %1503 = vsyncadd (%p2054_p2), %s366_s10, 4294967232  ;;  %p2055_p7 = scmp.eq.s32.totalorder %s1646_s9, 0 }
  0xf5   : > { %1505 = dma.done.wait (%p2055_p7), [#allocation7], 1024   ;;  %p2056_p3 = pmov %p2055_p7 }
  0xf7   : > { %1507 = vsyncadd (%p2056_p3), [#allocation7], 4294966272  ;;  %p2057_p10 = pmov %p2056_p3 }
  0xf8   : > { %p2058_p1 = pmov %p2056_p3 }
  0xf9   : > { %1509 = dma.done.wait (%p2057_p10), [#allocation10], 2048  }
  0xfa   : > { %1511 = vsyncadd (%p2058_p1), [#allocation10], 4294965248  ;;  %p2059_p5 = pmov %p2058_p1 }
  0xfb   : > { %p2060_p12 = pmov %p2058_p1 }
  0xfc   : > { %1513 = dma.done.wait (%p2059_p5), [#allocation13], 528  }
  0xfd   : > { %1515 = vsyncadd (%p2060_p12), [#allocation13], 4294966768  ;;  %s998_s21 = sshll.u32 %s1901_s18, 3  ;;  %s2061_s7 = sld [smem:[#allocation22_spill]] }
  0xfe   : > { %s1931_s6 = scalar_lea.vmem [#allocation15], %s998_s21 }
 0x103   : > { %p999_p13 = scmp.ne.s32.totalorder %s2061_s7, 0 }
 0x104   : > { %vm430_vm0 = vcmask (!%p999_p13), 261120   ;;  %v1561_v0 = vmov (!%p999_p13), 0.0  }
 0x105   : > { %429 = sbr.rel (%p999_p13) target bundleno = 268 (0x10c), region = 80  ;;  %431 = vst.msk [vmem:[#allocation2] sm:$0xff] (!%p999_p13), %vm430_vm0, %v1561_v0 }
 0x10c PF: > { %s2062_s11 = sld [smem:[#allocation22_spill]]  ;;  %v1562_v1 = vmov 0.0   ;;  %vm1563_vm1 = vmmov 0   ;;  %v433_v6 = vld [vmem:[%s1912_s15] sm:$0xf]  ;;  %vm453_vm2 = vcmask 261120  }
 0x10d   : > { %1052 = vmatprep.subr.bf16.mxu1 %v1562_v1  ;;  %1044 = vmatprep.subr.bf16.mxu0 %v1562_v1  ;;  %v432_v7 = vld [vmem:[%s1905_s3] sm:$0xf]  ;;  %vm619_vm3 = vcmask 130048   ;;  %vm666_vm4 = vcmask 64512   ;;  %vm680_vm5 = vcmask 1043456   ;;  %v727_v47 = vld [vmem:[#allocation2] sm:$0xff] }
 0x10e   : > { %1056 = vmatprep.mubr.msk.bf16.mxu1 %vm1563_vm1, %v1562_v1  ;;  %1048 = vmatprep.mubr.msk.bf16.mxu0 %vm1563_vm1, %v1562_v1 }
 0x112   : > { %s1935_s12 = sshll.u32 %s2062_s11, 4  ;;  %s1028_s4 = sshll.u32 %s2062_s11, 3 }
 0x113   : > { %s499_s9 = scalar_lea.vmem [#allocation9], %s1935_s12  ;;  %s436_s13 = scalar_lea.vmem [#allocation8], %s1935_s12 }
 0x114   : > { %v1225_v2 = vld [vmem:[%s499_s9] sm:$0xff]   ;;  %v1226_v3 = vld [vmem:[%s499_s9 + $0x8] sm:$0xff]   ;;  %s561_s2 = scalar_lea.vmem [#allocation11], %s1935_s12  ;;  %s730_s14 = scalar_lea.vmem [#allocation12], %s1028_s4 }
 0x115   : > { %1053 = vmatpush3.bf16.msra.mxu1 %v1225_v2  ;;  %v1227_v4 = vld [vmem:[%s436_s13] sm:$0xff]   ;;  %v1228_v5 = vld [vmem:[%s436_s13 + $0x8] sm:$0xff]   ;;  %p1019_p0 = scmp.ne.s32.totalorder %s2062_s11, 3 }
 0x116   : > { %1054 = vmatprep.subr.bf16.mxu1 %v1562_v1  ;;  %1045 = vmatpush3.bf16.msra.mxu0 %v1227_v4  ;;  %v1229_v8 = vld [vmem:[%s561_s2] sm:$0xff]   ;;  %v1230_v9 = vld [vmem:[%s561_s2 + $0x8] sm:$0xff]   ;;  %v1020_v54 = vld [vmem:[#allocation14] ss:$0 sm:$0xff] (!%p1019_p0) }
 0x117   : > { %1046 = vmatprep.subr.bf16.mxu0 %v1562_v1  ;;  %v1231_v38 = vld [vmem:[%s730_s14] sm:$0xff]  }
 0x119   : > { %1055 = vmatpush3.bf16.msra.mxu1 %v1226_v3 }
 0x11a   : > { %1068 = vmatprep.subr.bf16.mxu1 %v1562_v1  ;;  %1047 = vmatpush3.bf16.msra.mxu0 %v1228_v5 }
 0x11b   : > { %1060 = vmatprep.subr.bf16.mxu0 %v1562_v1 }
 0x11c   : > { %1057 = vmatmul.mubr.msk.bf16.vlgmr.msra.gmra.mrb[0].mxu1 %vm453_vm2, %v433_v6 }
 0x11d   : > { %1070 = vmatprep.mubr.msk.bf16.mxu1 %vm1563_vm1, %v1562_v1  ;;  %1049 = vmatmul.mubr.msk.bf16.vlgmr.msra.gmra.mrb[0].mxu0 %vm453_vm2, %v432_v7 }
 0x11e   : > { %1064 = vmatprep.mubr.msk.bf16.mxu0 %vm1563_vm1, %v1562_v1  ;;  %1061 = vmatpush3.bf16.msra.mxu0 %v1229_v8 }
 0x11f   : > { %1062 = vmatprep.subr.bf16.mxu0 %v1562_v1 }
 0x122   : > { %1063 = vmatpush3.bf16.msra.mxu0 %v1230_v9 }
 0x123   : > { %1074 = vmatprep.subr.bf16.mxu0 %v1562_v1 }
 0x125   : > { %1065 = vmatmul.mubr.msk.bf16.vlgmr.msra.gmra.mrb[4].mxu0 %vm453_vm2, %v433_v6 }
 0x126   : > { %1076 = vmatprep.mubr.msk.bf16.mxu0 %vm1563_vm1, %v1562_v1 }
 0x1ef   : > { %v553_v10 = vpop.f32.mrb[0].mxu1 }
 0x1f0   : > { %v559_v11 = vpack.c.bf16 %v553_v10, %v553_v10  ;;  %v1058_v12 = vpop.f32.mrb[1].mxu1  ;;  %v491_v14 = vpop.f32.mrb[0].mxu0 }
 0x1f1   : > { %v556_v13 = vpop.f32.mrb[2].mxu1  ;;  %v1050_v17 = vpop.f32.mrb[1].mxu0  ;;  %v497_v20 = vpack.c.bf16 %v491_v14, %v491_v14 }
 0x1f2   : > { %v624_v15 = vsel %vm619_vm3, %v559_v11, 0  ;;  %v1059_v16 = vpop.f32.mrb[3].mxu1  ;;  %v494_v18 = vpop.f32.mrb[2].mxu0 }
 0x1f3   : > { %1069 = vmatpush3.bf16.xpose.msra.mxu1 %v624_v15  ;;  %v1051_v19 = vpop.f32.mrb[3].mxu0 }
 0x1f4   : > { %1080 = vmatprep.subr.bf16.mxu1 %v1562_v1 }
 0x1f8   : > { %v612_v26 = vpop.f32.mrb[4].mxu0 }
 0x1f9   : > { %v618_v27 = vpack.c.bf16 %v612_v26, %v612_v26  ;;  %v1066_v28 = vpop.f32.mrb[5].mxu0 }
 0x1fa   : > { %1071 = vmatmul.mubr.msk.bf16.vlgmr.msra.gmra.mrb[4].mxu1 %vm619_vm3, %v497_v20  ;;  %v615_v29 = vpop.f32.mrb[6].mxu0 }
 0x1fb   : > { %1082 = vmatprep.mubr.msk.bf16.mxu1 %vm1563_vm1, %v1562_v1  ;;  %v682_v30 = vsel %vm680_vm5, %v618_v27, 0  ;;  %v1067_v31 = vpop.f32.mrb[7].mxu0  ;;  %1081 = vmatpush3.bf16.msra.mxu1 %v1231_v38 }
 0x1fc   : > { %1075 = vmatpush3.bf16.msra.mxu0 %v682_v30 }
 0x2cd   : > { %v660_v21 = vpop.f32.mrb[4].mxu1 }
 0x2ce   : > { %v1072_v22 = vpop.f32.mrb[5].mxu1  ;;  %v667_v23 = vsel %vm666_vm4, %v660_v21, -inf }
 0x2cf   : > { %668 = vmax.xlane.f32.xlu0 %v667_v23  ;;  %v663_v24 = vpop.f32.mrb[6].mxu1 }
 0x2d0   : > { %v1073_v25 = vpop.f32.mrb[7].mxu1 }
 0x35c   : > { %v669_v32 = vpop.xlane.xlu0 %668 }
 0x35d   : > { %v670_v33 = vsub.f32 %v660_v21, %v669_v32 }
 0x35f   : > { %v671_v34 = vmul.f32 1.442695, %v670_v33 }
 0x361   : > { %1232 = vpow2.f32 %v671_v34 }
 0x36b   : > { %v1233_v35 = vpop.eup %1232 }
 0x36c   : > { %v673_v36 = vsel %vm666_vm4, %v1233_v35, 0.0  ;;  %v676_v37 = vpack.c.bf16 %v1233_v35, %v1233_v35 }
 0x36d   : > { %674 = vadd.xlane.f32.xlu0 %v673_v36 }
 0x36e   : > { %1077 = vmatmul.mubr.msk.bf16.vlgmr.msra.gmra.mrb[8].mxu0 %vm666_vm4, %v676_v37 }
 0x3fa   : > { %v675_v39 = vpop.xlane.xlu0 %674 }
 0x3fb   : > { %1234 = vrcp.f32 %v675_v39 }
 0x405   : > { %v1235_v40 = vpop.eup %1234 }
 0x441   : > { %v718_v41 = vpop.f32.mrb[8].mxu0 }
 0x442   : > { %v725_v42 = vmul.f32 %v1235_v40, %v718_v41  ;;  %v1078_v43 = vpop.f32.mrb[9].mxu0 }
 0x443   : > { %v721_v44 = vpop.f32.mrb[10].mxu0 }
 0x444   : > { %v726_v45 = vpack.c.bf16 %v725_v42, %v725_v42  ;;  %v1079_v46 = vpop.f32.mrb[11].mxu0 }
 0x446   : > { %1083 = vmatmul.mubr.msk.bf16.vlgmr.msra.gmra.mrb[8].mxu1 %vm619_vm3, %v726_v45 }
 0x516   : > { %787 = sbr.rel (%p1019_p0) target bundleno = 1319 (0x527), region = 84 }
 0x519   : > { %v776_v48 = vpop.f32.mrb[8].mxu1 }
 0x51a   : > { %v782_v49 = vadd.f32 %v776_v48, %v727_v47  ;;  %v1084_v50 = vpop.f32.mrb[9].mxu1 }
 0x51b   : > { %v779_v51 = vpop.f32.mrb[10].mxu1 }
 0x51c   : > { %783 = vst.msk [vmem:[#allocation2] sm:$0xff] %vm453_vm2, %v782_v49  ;;  %v1085_v52 = vpop.f32.mrb[11].mxu1 }
 0x523   : > { %v788_v53 = vld [vmem:[#allocation2] sm:$0xff] }
 0x524   : > { %v796_v55 = vadd.f32 %v1020_v54, %v788_v53 }
 0x526   : > { %797 = vst.msk [vmem:[%s1931_s6] sm:$0xff] %vm453_vm2, %v796_v55 }
 0x527 PF: > { %s2063_s19 = sld [smem:[#allocation23_spill]]  ;;  %s2064_s3 = sld [smem:[#allocation30_spill]] }
 0x528   : > { %s813_s10 = sshll.u32 %s1931_s6, 4  ;;  %s799_s15 = scalar_lea.sflag [#allocation5], %s1901_s18  ;;  %s814_s10 = int_to_ptr.vmem [resolvable:$true] %s813_s10 }
 0x529   : > { %s1436_s21 = scalar_lea.vmem %s814_s10, 128  ;;  %p2065_p8 = scmp.ne.s32.totalorder %s2050_s27, 0 }
 0x52a   : > { %p1437_p6 = scmp.ne.s32.totalorder %s814_s10, %s1436_s21  ;;  %s1564_s7 = smov [#allocation15]  }
 0x52b   : > { %s1440_s11 = sshll.u32 %s1564_s7, 4  ;;  %s1441_s11 = int_to_ptr.vmem [resolvable:$false] %s1440_s11 }
 0x52c   : > { %p1438_p4 = pnand %p1437_p6, %p2065_p8  ;;  %s1442_s12 = scalar_lea.vmem %s1441_s11, 256 }
 0x52d   : > { %s1022_s23 = sshll.u32 %s2063_s19, 7  ;;  %p1443_p11 = scmp.lt.s32.totalorder %s814_s10, %s1441_s11 }
 0x52e   : > { %s1966_s22 = scalar_lea.hbm %s2064_s3, %s1022_s23  ;;  %p1439_p9 = pneg %p1438_p4 }
 0x52f   : > { %p1444_p2 = scmp.lt.s32.totalorder %s1442_s12, %s1436_s21 }
 0x531   : > { %p1445_p7 = por %p1444_p2, %p1443_p11 }
 0x533   : > { %p1446_p3 = pnand %p1445_p7, %p1439_p9 }
 0x535   : > { %1449 = shalt.err (!%p1446_p3)
}
 0x536   : > { %s1450_s18 = scalar_lea.hbm %s1966_s22, 128  ;;  %s1454_s13 = scalar_lea.hbm %s2064_s3, 256 }
 0x537   : > { %p1451_p10 = scmp.ne.s32.totalorder %s1966_s22, %s1450_s18  ;;  %p1455_p12 = scmp.lt.u32.totalorder %s1966_s22, %s2064_s3 }
 0x538   : > { %p1456_p13 = scmp.lt.u32.totalorder %s1454_s13, %s1450_s18  ;;  %p1458_p6 = scmp.lt.u32.totalorder %s1450_s18, %s1966_s22 }
 0x539   : > { %p1452_p1 = pnand %p1451_p10, %p2065_p8 }
 0x53a   : > { %p1457_p0 = por %p1456_p13, %p1455_p12 }
 0x53b   : > { %p1453_p5 = pneg %p1452_p1 }
 0x53c   : > { %p1459_p4 = por %p1458_p6, %p1457_p0 }
 0x53e   : > { %p1460_p9 = pnand %p1459_p4, %p1453_p5 }
 0x540   : > { %1463 = shalt.err (!%p1460_p9)
}
 0x541   : > { %1110 = dma.vmem_to_hbm [thread:$0]  (%p2065_p8), %s814_s10, 128, %s1966_s22, %s799_s15  }
 0x542 PF: > { %p1150_p11 = scmp.ge.s32.totalorder %s1550_s8, 2  ;;  %s825_s14 = sand.u32 1, %s1522_s24  }
 0x543   : > { %p2066_p2 = scmp.ne.s32.totalorder %s2051_s20, 0  ;;  %s826_s19 = scalar_lea.sflag [#allocation5], %s825_s14 }
 0x545   : > { %p1136_p7 = pnand %p1150_p11, %p2066_p2 }
 0x547   : > { %1517 = dma.done.wait (!%p1136_p7), %s826_s19, 128  }
 0x548   : > { %1519 = vsyncadd (!%p1136_p7), %s826_s19, 4294967168  ;;  %s28_s8 = sadd.s32 1, %s1550_s8   ;;  %s2067_s23 = sld [smem:[#allocation24_spill]] }
 0x549   : > { %p25_p3 = scmp.ge.s32.totalorder %s28_s8, 10   ;;  %s2068_s24 = smov %s1526_s25 }
 0x54a   : > { %s2069_s25 = smov %s1530_s26  ;;  %s2070_s26 = smov %s1828_s16 }
 0x54b   : > { %s2071_s27 = smov %s1542_s29  ;;  %s2072_s28 = smov %s1546_s30 }
 0x54c   : > { %s2073_s29 = smov %s2076_s17  ;;  %27 = sbr.rel (!%p25_p3) target bundleno = 18 (0x12), region = 138 }
 0x54e   : > { %s2074_s30 = smov %s2067_s23 }
 0x553   :  { %831 = vsyncpa [#allocation4], 1 }
 0x554   :  { %833 = vsyncpa [#allocation4 + $0x1], 1 }
 0x555   :  { %834 = vsyncpa [#allocation7], 1 }
 0x556   :  { %836 = vsyncpa [#allocation7 + $0x1], 1 }
 0x557   :  { %837 = vsyncpa [#allocation10], 1 }
 0x558   :  { %838 = vsyncpa [#allocation13], 1 }
 0x559   :  { %839 = vsyncpa [#allocation5], 1 }
 0x55a   :  { %841 = vsyncpa [#allocation5 + $0x1], 1 }

</bundles_post_ra>
